<compile_context>
chip_gen: v7x
topology: tpu7x:2x2x1
jax: 0.10.0
libtpu: 0.0.40
codegen_flags: <defaults>
</compile_context>

<pallas_src>
import math

import jax
import jax.numpy as jnp
import numpy as np
from jax.experimental import pallas as pl
from jax.experimental.pallas import tpu as pltpu

# ---------------- config (small, synthetic) ----------------
B = 2            # batch
S = 16           # encoder sequence length
Q = 8            # number of query tokens
D = 32           # mm_audio_hidden_size (decoder width)
F = 4 * D        # decoder FFN width (128)
HOUT = 64        # config.hidden_size (LLM width)
NUM_HEADS = 4
HEAD_DIM = D // NUM_HEADS   # 8
LN_EPS = 1e-5

HPAD = 128       # lane-dense padded projector width (multiple of 128, >= HOUT)

# wmat slab column layout (every segment starts on a 128-lane boundary):
#   [  0: 96)  sa_wqkv = [Wq | Wk | Wv]
#   [128:160)  ca_wq
#   [256:320)  ca_wkv  = [Wk | Wv]
#   [384:512)  ff_w1
#   [512:640)  proj_w (zero-padded from HOUT=64 to 128)
WMAT_COLS = 5 * 128
VEC_ROWS = 16     # one 128-lane row per vector parameter (see pack_params)


# ---------------- in-kernel helpers ----------------
def _layer_norm(x, g, b):
    mu = jnp.mean(x, axis=-1, keepdims=True)
    xc = x - mu
    var = jnp.mean(xc * xc, axis=-1, keepdims=True)
    return xc * jax.lax.rsqrt(var + LN_EPS) * g + b


def _block_mask(tq, tk, gq, gk):
    """Additive bias: 0 where query-group == key-group (same batch element), -1e30 elsewhere."""
    qi = jax.lax.broadcasted_iota(jnp.int32, (tq, tk), 0).astype(jnp.float32)
    ki = jax.lax.broadcasted_iota(jnp.int32, (tq, tk), 1).astype(jnp.float32)
    qb = jnp.floor(qi * (1.0 / gq))
    kb = jnp.floor(ki * (1.0 / gk))
    return jnp.where(qb == kb, 0.0, -1e30)


def _heads(x):
    """(T, D) -> (H, T, HEAD_DIM): static lane slices stacked on a new leading axis."""
    return jnp.stack(
        [x[:, h * HEAD_DIM:(h + 1) * HEAD_DIM] for h in range(NUM_HEADS)], axis=0)


def _attention_core(q, k, v, wo_heads, bo, mask_bias):
    """Multi-head attention with heads batched in single leading-batch-dim contractions.

    q: (Tq, D)   k, v: (Tkv, D)   wo_heads: (H, HEAD_DIM, D)   bo: (1, D)
    mask_bias: (Tq, Tkv) additive block-diagonal mask (folds the batch dim).
    """
    qh, kh, vh = _heads(q), _heads(k), _heads(v)                       # (H, T*, hd)
    s = jnp.einsum('hqd,hkd->hqk', qh, kh, preferred_element_type=jnp.float32)
    s = s * (1.0 / math.sqrt(HEAD_DIM)) + mask_bias[None, :, :]        # (H, Tq, Tkv)
    s = s - jnp.max(s, axis=-1, keepdims=True)
    e = jnp.exp(s)
    p = e * pl.reciprocal(jnp.sum(e, axis=-1, keepdims=True), approx=True)
    o = jnp.einsum('hqk,hkd->hqd', p, vh, preferred_element_type=jnp.float32)   # (H, Tq, hd)
    # Fold the head concat into per-head output projections, summed over heads (no lane concat).
    out = jnp.einsum('hqd,hde->hqe', o, wo_heads, preferred_element_type=jnp.float32)
    return jnp.sum(out, axis=0) + bo                                   # (Tq, D)


# ---------------- Pallas kernel ----------------
def _aligner_kernel(enc_ref, qry_ref, wmat_ref, ffw2_ref, woh_ref, vec_ref, out_ref):
    enc = enc_ref[...]            # (B*S, D)
    h = qry_ref[...]              # (B*Q, D)

    # weight slab segments (static, 128-aligned lane slices)
    sa_wqkv = wmat_ref[:, 0:3 * D]
    ca_wq = wmat_ref[:, 128:128 + D]
    ca_wkv = wmat_ref[:, 256:256 + 2 * D]
    ff_w1 = wmat_ref[:, 384:384 + F]
    proj_w = wmat_ref[:, 512:512 + HPAD]
    ff_w2 = ffw2_ref[...]                     # (F, D)
    sa_woH = woh_ref[0]                       # (H, HEAD_DIM, D)
    ca_woH = woh_ref[1]

    def vec(row, width):
        return vec_ref[row:row + 1, 0:width]  # (1, width)

    ln1_g, ln1_b = vec(0, D), vec(1, D)
    sa_b_qkv = vec(2, 3 * D)                  # [bq | 0 (k has no bias) | bv]
    sa_bo = vec(3, D)
    ln2_g, ln2_b = vec(4, D), vec(5, D)
    ca_bq = vec(6, D)
    ca_b_kv = vec(7, 2 * D)                   # [0 (k has no bias) | bv]
    ca_bo = vec(8, D)
    ln3_g, ln3_b = vec(9, D), vec(10, D)
    ff_b1 = vec(11, F)
    ff_b2 = vec(12, D)
    lnf_g, lnf_b = vec(13, D), vec(14, D)
    proj_b = vec(15, HPAD)

    self_mask = _block_mask(B * Q, B * Q, Q, Q)
    cross_mask = _block_mask(B * Q, B * S, Q, S)

    # --- self-attention over the query tokens (block-diagonal across batch) ---
    x = _layer_norm(h, ln1_g, ln1_b)
    qkv = jnp.dot(x, sa_wqkv, preferred_element_type=jnp.float32) + sa_b_qkv   # (B*Q, 3D)
    q, k, v = qkv[:, 0:D], qkv[:, D:2 * D], qkv[:, 2 * D:3 * D]
    h = h + _attention_core(q, k, v, sa_woH, sa_bo, self_mask)

    # --- cross-attention: queries attend to their batch element's encoder output ---
    x = _layer_norm(h, ln2_g, ln2_b)
    q = jnp.dot(x, ca_wq, preferred_element_type=jnp.float32) + ca_bq          # (B*Q, D)
    kv = jnp.dot(enc, ca_wkv, preferred_element_type=jnp.float32) + ca_b_kv    # (B*S, 2D)
    k, v = kv[:, 0:D], kv[:, D:2 * D]
    h = h + _attention_core(q, k, v, ca_woH, ca_bo, cross_mask)

    # --- GELU MLP ---
    # TODO(synk): PyTorch nn.GELU / Whisper "gelu" is the exact erf form; tanh approximation used.
    x = _layer_norm(h, ln3_g, ln3_b)
    f = jax.nn.gelu(jnp.dot(x, ff_w1, preferred_element_type=jnp.float32) + ff_b1,
                    approximate=True)
    h = h + jnp.dot(f, ff_w2, preferred_element_type=jnp.float32) + ff_b2

    # --- final decoder LayerNorm + linear projector (lane-dense 128-wide store) ---
    h = _layer_norm(h, lnf_g, lnf_b)
    out_ref[...] = jnp.dot(h, proj_w, preferred_element_type=jnp.float32) + proj_b


def audio_aligner_forward(encoder_output, query_tokens, packed):
    wmat, ff_w2, wo_heads, vecs = packed
    b, s, d = encoder_output.shape
    _, q, _ = query_tokens.shape
    enc2 = encoder_output.reshape(b * s, d)
    qry2 = query_tokens.reshape(b * q, d)

    vmem = pl.BlockSpec(memory_space=pltpu.MemorySpace.VMEM)   # whole array in VMEM, no grid
    out = pl.pallas_call(
        _aligner_kernel,
        out_shape=jax.ShapeDtypeStruct((b * q, HPAD), jnp.float32),
        in_specs=[vmem] * 6,
        out_specs=vmem,
    )(enc2, qry2, wmat, ff_w2, wo_heads, vecs)
    return out[:, :HOUT].reshape(b, q, HOUT)


# ---------------- deterministic synthetic parameters ----------------
PARAM_SHAPES = [
    ("ln1_g", (1, D)), ("ln1_b", (1, D)),
    ("sa_wq", (D, D)), ("sa_bq", (1, D)), ("sa_wk", (D, D)), ("sa_wv", (D, D)),
    ("sa_bv", (1, D)), ("sa_wo", (D, D)), ("sa_bo", (1, D)),
    ("ln2_g", (1, D)), ("ln2_b", (1, D)),
    ("ca_wq", (D, D)), ("ca_bq", (1, D)), ("ca_wk", (D, D)), ("ca_wv", (D, D)),
    ("ca_bv", (1, D)), ("ca_wo", (D, D)), ("ca_bo", (1, D)),
    ("ln3_g", (1, D)), ("ln3_b", (1, D)),
    ("ff_w1", (D, F)), ("ff_b1", (1, F)), ("ff_w2", (F, D)), ("ff_b2", (1, D)),
    ("lnf_g", (1, D)), ("lnf_b", (1, D)),
    ("proj_w", (D, HOUT)), ("proj_b", (1, HOUT)),
]
_LN_BETAS = {"ln1_b", "ln2_b", "ln3_b", "lnf_b"}


def init_params(key):
    params = []
    for i, (name, shape) in enumerate(PARAM_SHAPES):
        if name.endswith("_g"):
            params.append(jnp.ones(shape, jnp.float32))
        elif name in _LN_BETAS:
            params.append(jnp.zeros(shape, jnp.float32))
        else:
            params.append(0.02 * jax.random.normal(jax.random.fold_in(key, i), shape, jnp.float32))
    return tuple(params)


def pack_params(p):
    """Pack the 28 natural-shape parameters into 4 lane-dense slabs (host side, one-time)."""
    (ln1_g, ln1_b,
     sa_wq, sa_bq, sa_wk, sa_wv, sa_bv, sa_wo, sa_bo,
     ln2_g, ln2_b,
     ca_wq, ca_bq, ca_wk, ca_wv, ca_bv, ca_wo, ca_bo,
     ln3_g, ln3_b,
     ff_w1, ff_b1, ff_w2, ff_b2,
     lnf_g, lnf_b,
     proj_w, proj_b) = p

    def seg(w):  # pad a (D, x<=128) matrix to a 128-lane column segment
        return jnp.pad(w, ((0, 0), (0, 128 - w.shape[1])))

    wmat = jnp.concatenate([
        seg(jnp.concatenate([sa_wq, sa_wk, sa_wv], axis=1)),   # [  0:128)  fused self QKV (96 used)
        seg(ca_wq),                                            # [128:256)  cross Q        (32 used)
        seg(jnp.concatenate([ca_wk, ca_wv], axis=1)),          # [256:384)  fused cross KV (64 used)
        seg(ff_w1),                                            # [384:512)  FFN up         (128 used)
        seg(proj_w),                                           # [512:640)  projector      (64 used)
    ], axis=1).astype(jnp.float32)                             # (D, 640)

    wo_heads = jnp.stack([sa_wo.reshape(NUM_HEADS, HEAD_DIM, D),
                          ca_wo.reshape(NUM_HEADS, HEAD_DIM, D)], axis=0).astype(jnp.float32)

    def row(v):  # one vector parameter per 128-lane row
        v = v.reshape(1, -1)
        return jnp.pad(v, ((0, 0), (0, 128 - v.shape[1])))

    zero_d = jnp.zeros((1, D), jnp.float32)
    vecs = jnp.concatenate([
        row(ln1_g), row(ln1_b),
        row(jnp.concatenate([sa_bq, zero_d, sa_bv], axis=1)),  # fused qkv bias (k_proj has no bias)
        row(sa_bo),
        row(ln2_g), row(ln2_b),
        row(ca_bq),
        row(jnp.concatenate([zero_d, ca_bv], axis=1)),         # fused kv bias
        row(ca_bo),
        row(ln3_g), row(ln3_b),
        row(ff_b1), row(ff_b2),
        row(lnf_g), row(lnf_b),
        row(proj_b),
    ], axis=0).astype(jnp.float32)                             # (16, 128)

    return wmat, ff_w2.astype(jnp.float32), wo_heads, vecs


# ---------------- pure-JAX reference (unpacked params, per-batch / per-head loops) ----------------
def reference_forward(encoder_output, query_tokens, p):
    (ln1_g, ln1_b,
     sa_wq, sa_bq, sa_wk, sa_wv, sa_bv, sa_wo, sa_bo,
     ln2_g, ln2_b,
     ca_wq, ca_bq, ca_wk, ca_wv, ca_bv, ca_wo, ca_bo,
     ln3_g, ln3_b,
     ff_w1, ff_b1, ff_w2, ff_b2,
     lnf_g, lnf_b,
     proj_w, proj_b) = p

    def ln(x, g, b):
        mu = jnp.mean(x, -1, keepdims=True)
        var = jnp.mean((x - mu) ** 2, -1, keepdims=True)
        return (x - mu) / jnp.sqrt(var + LN_EPS) * g + b

    def mha(xq, xkv, wq, bq, wk, wv, bv, wo, bo):
        qf = xq @ wq + bq
        kf = xkv @ wk                      # Whisper k_proj has no bias
        vf = xkv @ wv + bv
        outs = []
        for h in range(NUM_HEADS):
            sl = slice(h * HEAD_DIM, (h + 1) * HEAD_DIM)
            s = (qf[:, sl] @ kf[:, sl].T) / math.sqrt(HEAD_DIM)
            outs.append(jax.nn.softmax(s, axis=-1) @ vf[:, sl])
        return jnp.concatenate(outs, axis=-1) @ wo + bo

    def one(enc, qry):
        h = qry
        x = ln(h, ln1_g, ln1_b)
        h = h + mha(x, x, sa_wq, sa_bq, sa_wk, sa_wv, sa_bv, sa_wo, sa_bo)
        x = ln(h, ln2_g, ln2_b)
        h = h + mha(x, enc, ca_wq, ca_bq, ca_wk, ca_wv, ca_bv, ca_wo, ca_bo)
        x = ln(h, ln3_g, ln3_b)
        f = jax.nn.gelu(x @ ff_w1 + ff_b1, approximate=True)
        h = h + f @ ff_w2 + ff_b2
        h = ln(h, lnf_g, lnf_b)
        return h @ proj_w + proj_b

    return jnp.stack([one(encoder_output[i], query_tokens[i])
                      for i in range(encoder_output.shape[0])])


if __name__ == "__main__":
    key = jax.random.PRNGKey(0)
    k_enc, k_qry, k_par = jax.random.split(key, 3)

    encoder_output = jax.random.normal(k_enc, (B, S, D), jnp.float32)   # whisper encoder features
    query_tokens = jax.random.normal(k_qry, (B, Q, D), jnp.float32)     # learnable query tokens
    params = init_params(k_par)
    packed = pack_params(params)

    out = jax.block_until_ready(audio_aligner_forward(encoder_output, query_tokens, packed))
    ref = jax.block_until_ready(reference_forward(encoder_output, query_tokens, params))

    # tolerance loosened from 1e-4 because the kernel uses the EUP approximate reciprocal
    # for the softmax normalization (pl.reciprocal(approx=True)).
    np.testing.assert_allclose(np.asarray(out), np.asarray(ref), rtol=2e-3, atol=2e-3)
    assert out.shape == (B, Q, HOUT) and out.dtype == jnp.float32

    print("KERNEL_OK")
</pallas_src>

<mosaic_0001>
module attributes {stable_mosaic.version = 11 : i64} {
  func.func @_aligner_kernel(%arg0: memref<32x32xf32, #tpu.memory_space<vmem>>, %arg1: memref<16x32xf32, #tpu.memory_space<vmem>>, %arg2: memref<32x640xf32, #tpu.memory_space<vmem>>, %arg3: memref<128x32xf32, #tpu.memory_space<vmem>>, %arg4: memref<2x4x8x32xf32, #tpu.memory_space<vmem>>, %arg5: memref<16x128xf32, #tpu.memory_space<vmem>>, %arg6: memref<16x128xf32, #tpu.memory_space<vmem>>) attributes {dimension_semantics = [], scalar_prefetch = 0 : i64, scratch_operands = 0 : i64, tpu.core_type = #tpu.core_type<tc>} {
    %c0 = arith.constant 0 : index
    %c0_0 = arith.constant 0 : index
    %0 = vector.load %arg0[%c0, %c0_0] : memref<32x32xf32, #tpu.memory_space<vmem>>, vector<32x32xf32>
    %c0_1 = arith.constant 0 : index
    %c0_2 = arith.constant 0 : index
    %1 = vector.load %arg1[%c0_1, %c0_2] : memref<16x32xf32, #tpu.memory_space<vmem>>, vector<16x32xf32>
    %c0_3 = arith.constant 0 : index
    %c0_4 = arith.constant 0 : index
    %2 = vector.load %arg2[%c0_3, %c0_4] : memref<32x640xf32, #tpu.memory_space<vmem>>, vector<32x96xf32>
    %c0_5 = arith.constant 0 : index
    %c128 = arith.constant 128 : index
    %3 = vector.load %arg2[%c0_5, %c128] : memref<32x640xf32, #tpu.memory_space<vmem>>, vector<32x32xf32>
    %c0_6 = arith.constant 0 : index
    %c256 = arith.constant 256 : index
    %4 = vector.load %arg2[%c0_6, %c256] : memref<32x640xf32, #tpu.memory_space<vmem>>, vector<32x64xf32>
    %c0_7 = arith.constant 0 : index
    %c384 = arith.constant 384 : index
    %5 = vector.load %arg2[%c0_7, %c384] : memref<32x640xf32, #tpu.memory_space<vmem>>, vector<32x128xf32>
    %c0_8 = arith.constant 0 : index
    %c512 = arith.constant 512 : index
    %6 = vector.load %arg2[%c0_8, %c512] : memref<32x640xf32, #tpu.memory_space<vmem>>, vector<32x128xf32>
    %c0_9 = arith.constant 0 : index
    %c0_10 = arith.constant 0 : index
    %7 = vector.load %arg3[%c0_9, %c0_10] : memref<128x32xf32, #tpu.memory_space<vmem>>, vector<128x32xf32>
    %c0_11 = arith.constant 0 : index
    %c0_12 = arith.constant 0 : index
    %c0_13 = arith.constant 0 : index
    %c0_14 = arith.constant 0 : index
    %8 = vector.load %arg4[%c0_11, %c0_12, %c0_13, %c0_14] : memref<2x4x8x32xf32, #tpu.memory_space<vmem>>, vector<1x4x8x32xf32>
    %9 = vector.shape_cast %8 : vector<1x4x8x32xf32> to vector<4x8x32xf32>
    %c1 = arith.constant 1 : index
    %c0_15 = arith.constant 0 : index
    %c0_16 = arith.constant 0 : index
    %c0_17 = arith.constant 0 : index
    %10 = vector.load %arg4[%c1, %c0_15, %c0_16, %c0_17] : memref<2x4x8x32xf32, #tpu.memory_space<vmem>>, vector<1x4x8x32xf32>
    %11 = vector.shape_cast %10 : vector<1x4x8x32xf32> to vector<4x8x32xf32>
    %c0_18 = arith.constant 0 : index
    %c0_19 = arith.constant 0 : index
    %12 = vector.load %arg5[%c0_18, %c0_19] : memref<16x128xf32, #tpu.memory_space<vmem>>, vector<1x32xf32>
    %c1_20 = arith.constant 1 : index
    %c0_21 = arith.constant 0 : index
    %13 = vector.load %arg5[%c1_20, %c0_21] : memref<16x128xf32, #tpu.memory_space<vmem>>, vector<1x32xf32>
    %c2 = arith.constant 2 : index
    %c0_22 = arith.constant 0 : index
    %14 = vector.load %arg5[%c2, %c0_22] : memref<16x128xf32, #tpu.memory_space<vmem>>, vector<1x96xf32>
    %c3 = arith.constant 3 : index
    %c0_23 = arith.constant 0 : index
    %15 = vector.load %arg5[%c3, %c0_23] : memref<16x128xf32, #tpu.memory_space<vmem>>, vector<1x32xf32>
    %c4 = arith.constant 4 : index
    %c0_24 = arith.constant 0 : index
    %16 = vector.load %arg5[%c4, %c0_24] : memref<16x128xf32, #tpu.memory_space<vmem>>, vector<1x32xf32>
    %c5 = arith.constant 5 : index
    %c0_25 = arith.constant 0 : index
    %17 = vector.load %arg5[%c5, %c0_25] : memref<16x128xf32, #tpu.memory_space<vmem>>, vector<1x32xf32>
    %c6 = arith.constant 6 : index
    %c0_26 = arith.constant 0 : index
    %18 = vector.load %arg5[%c6, %c0_26] : memref<16x128xf32, #tpu.memory_space<vmem>>, vector<1x32xf32>
    %c7 = arith.constant 7 : index
    %c0_27 = arith.constant 0 : index
    %19 = vector.load %arg5[%c7, %c0_27] : memref<16x128xf32, #tpu.memory_space<vmem>>, vector<1x64xf32>
    %c8 = arith.constant 8 : index
    %c0_28 = arith.constant 0 : index
    %20 = vector.load %arg5[%c8, %c0_28] : memref<16x128xf32, #tpu.memory_space<vmem>>, vector<1x32xf32>
    %c9 = arith.constant 9 : index
    %c0_29 = arith.constant 0 : index
    %21 = vector.load %arg5[%c9, %c0_29] : memref<16x128xf32, #tpu.memory_space<vmem>>, vector<1x32xf32>
    %c10 = arith.constant 10 : index
    %c0_30 = arith.constant 0 : index
    %22 = vector.load %arg5[%c10, %c0_30] : memref<16x128xf32, #tpu.memory_space<vmem>>, vector<1x32xf32>
    %c11 = arith.constant 11 : index
    %c0_31 = arith.constant 0 : index
    %23 = vector.load %arg5[%c11, %c0_31] : memref<16x128xf32, #tpu.memory_space<vmem>>, vector<1x128xf32>
    %c12 = arith.constant 12 : index
    %c0_32 = arith.constant 0 : index
    %24 = vector.load %arg5[%c12, %c0_32] : memref<16x128xf32, #tpu.memory_space<vmem>>, vector<1x32xf32>
    %c13 = arith.constant 13 : index
    %c0_33 = arith.constant 0 : index
    %25 = vector.load %arg5[%c13, %c0_33] : memref<16x128xf32, #tpu.memory_space<vmem>>, vector<1x32xf32>
    %c14 = arith.constant 14 : index
    %c0_34 = arith.constant 0 : index
    %26 = vector.load %arg5[%c14, %c0_34] : memref<16x128xf32, #tpu.memory_space<vmem>>, vector<1x32xf32>
    %c15 = arith.constant 15 : index
    %c0_35 = arith.constant 0 : index
    %27 = vector.load %arg5[%c15, %c0_35] : memref<16x128xf32, #tpu.memory_space<vmem>>, vector<1x128xf32>
    %28 = tpu.iota {dimensions = array<i32: 0>} : vector<16x16xi32>
    %29 = arith.sitofp %28 : vector<16x16xi32> to vector<16x16xf32>
    %30 = tpu.iota {dimensions = array<i32: 1>} : vector<16x16xi32>
    %31 = arith.sitofp %30 : vector<16x16xi32> to vector<16x16xf32>
    %cst = arith.constant 1.250000e-01 : f32
    %32 = vector.broadcast %cst : f32 to vector<16x16xf32>
    %33 = arith.mulf %29, %32 : vector<16x16xf32>
    %34 = math.floor %33 : vector<16x16xf32>
    %cst_36 = arith.constant 1.250000e-01 : f32
    %35 = vector.broadcast %cst_36 : f32 to vector<16x16xf32>
    %36 = arith.mulf %31, %35 : vector<16x16xf32>
    %37 = math.floor %36 : vector<16x16xf32>
    %38 = arith.cmpf oeq, %34, %37 : vector<16x16xf32>
    %cst_37 = arith.constant 0.000000e+00 : f32
    %cst_38 = arith.constant -1.000000e+30 : f32
    %39 = vector.broadcast %cst_37 : f32 to vector<16x16xf32>
    %40 = vector.broadcast %cst_38 : f32 to vector<16x16xf32>
    %41 = arith.select %38, %39, %40 : vector<16x16xi1>, vector<16x16xf32>
    %42 = tpu.iota {dimensions = array<i32: 0>} : vector<16x32xi32>
    %43 = arith.sitofp %42 : vector<16x32xi32> to vector<16x32xf32>
    %44 = tpu.iota {dimensions = array<i32: 1>} : vector<16x32xi32>
    %45 = arith.sitofp %44 : vector<16x32xi32> to vector<16x32xf32>
    %cst_39 = arith.constant 1.250000e-01 : f32
    %46 = vector.broadcast %cst_39 : f32 to vector<16x32xf32>
    %47 = arith.mulf %43, %46 : vector<16x32xf32>
    %48 = math.floor %47 : vector<16x32xf32>
    %cst_40 = arith.constant 6.250000e-02 : f32
    %49 = vector.broadcast %cst_40 : f32 to vector<16x32xf32>
    %50 = arith.mulf %45, %49 : vector<16x32xf32>
    %51 = math.floor %50 : vector<16x32xf32>
    %52 = arith.cmpf oeq, %48, %51 : vector<16x32xf32>
    %cst_41 = arith.constant 0.000000e+00 : f32
    %cst_42 = arith.constant -1.000000e+30 : f32
    %53 = vector.broadcast %cst_41 : f32 to vector<16x32xf32>
    %54 = vector.broadcast %cst_42 : f32 to vector<16x32xf32>
    %55 = arith.select %52, %53, %54 : vector<16x32xi1>, vector<16x32xf32>
    %cst_43 = arith.constant dense<0.000000e+00> : vector<16xf32>
    %56 = vector.multi_reduction <add>, %1, %cst_43 [1] : vector<16x32xf32> to vector<16xf32>
    %57 = vector.shape_cast %56 : vector<16xf32> to vector<16x1xf32>
    %cst_44 = arith.constant 3.200000e+01 : f32
    %58 = vector.broadcast %cst_44 : f32 to vector<16x1xf32>
    %59 = arith.divf %57, %58 : vector<16x1xf32>
    %60 = vector.broadcast %59 : vector<16x1xf32> to vector<16x32xf32>
    %61 = arith.subf %1, %60 : vector<16x32xf32>
    %62 = arith.mulf %61, %61 : vector<16x32xf32>
    %cst_45 = arith.constant dense<0.000000e+00> : vector<16xf32>
    %63 = vector.multi_reduction <add>, %62, %cst_45 [1] : vector<16x32xf32> to vector<16xf32>
    %64 = vector.shape_cast %63 : vector<16xf32> to vector<16x1xf32>
    %cst_46 = arith.constant 3.200000e+01 : f32
    %65 = vector.broadcast %cst_46 : f32 to vector<16x1xf32>
    %66 = arith.divf %64, %65 : vector<16x1xf32>
    %cst_47 = arith.constant 9.99999974E-6 : f32
    %67 = vector.broadcast %cst_47 : f32 to vector<16x1xf32>
    %68 = arith.addf %66, %67 : vector<16x1xf32>
    %69 = math.rsqrt %68 : vector<16x1xf32>
    %70 = vector.broadcast %69 : vector<16x1xf32> to vector<16x32xf32>
    %71 = arith.mulf %61, %70 : vector<16x32xf32>
    %72 = vector.broadcast %12 : vector<1x32xf32> to vector<16x32xf32>
    %73 = arith.mulf %71, %72 : vector<16x32xf32>
    %74 = vector.broadcast %13 : vector<1x32xf32> to vector<16x32xf32>
    %75 = arith.addf %73, %74 : vector<16x32xf32>
    %cst_48 = arith.constant dense<0.000000e+00> : vector<16x96xf32>
    %76 = tpu.matmul %75, %2, %cst_48 {dimension_numbers = #tpu.dot_dimension_numbers<[1], [0], [0], [1], [0, 0, 1, 1], [], []>} : vector<16x32xf32>, vector<32x96xf32>, vector<16x96xf32> -> vector<16x96xf32>
    %77 = vector.broadcast %14 : vector<1x96xf32> to vector<16x96xf32>
    %78 = arith.addf %76, %77 : vector<16x96xf32>
    %79 = vector.extract_strided_slice %78 {offsets = [0, 0], sizes = [16, 32], strides = [1, 1]} : vector<16x96xf32> to vector<16x32xf32>
    %80 = vector.extract_strided_slice %78 {offsets = [0, 32], sizes = [16, 32], strides = [1, 1]} : vector<16x96xf32> to vector<16x32xf32>
    %81 = vector.extract_strided_slice %78 {offsets = [0, 64], sizes = [16, 32], strides = [1, 1]} : vector<16x96xf32> to vector<16x32xf32>
    %82 = vector.extract_strided_slice %79 {offsets = [0, 0], sizes = [16, 8], strides = [1, 1]} : vector<16x32xf32> to vector<16x8xf32>
    %83 = vector.extract_strided_slice %79 {offsets = [0, 8], sizes = [16, 8], strides = [1, 1]} : vector<16x32xf32> to vector<16x8xf32>
    %84 = vector.extract_strided_slice %79 {offsets = [0, 16], sizes = [16, 8], strides = [1, 1]} : vector<16x32xf32> to vector<16x8xf32>
    %85 = vector.extract_strided_slice %79 {offsets = [0, 24], sizes = [16, 8], strides = [1, 1]} : vector<16x32xf32> to vector<16x8xf32>
    %86 = vector.shape_cast %82 : vector<16x8xf32> to vector<1x16x8xf32>
    %87 = vector.shape_cast %83 : vector<16x8xf32> to vector<1x16x8xf32>
    %88 = vector.shape_cast %84 : vector<16x8xf32> to vector<1x16x8xf32>
    %89 = vector.shape_cast %85 : vector<16x8xf32> to vector<1x16x8xf32>
    %90 = tpu.concatenate %86, %87, %88, %89 in 0 : vector<1x16x8xf32>, vector<1x16x8xf32>, vector<1x16x8xf32>, vector<1x16x8xf32> -> vector<4x16x8xf32>
    %91 = vector.extract_strided_slice %80 {offsets = [0, 0], sizes = [16, 8], strides = [1, 1]} : vector<16x32xf32> to vector<16x8xf32>
    %92 = vector.extract_strided_slice %80 {offsets = [0, 8], sizes = [16, 8], strides = [1, 1]} : vector<16x32xf32> to vector<16x8xf32>
    %93 = vector.extract_strided_slice %80 {offsets = [0, 16], sizes = [16, 8], strides = [1, 1]} : vector<16x32xf32> to vector<16x8xf32>
    %94 = vector.extract_strided_slice %80 {offsets = [0, 24], sizes = [16, 8], strides = [1, 1]} : vector<16x32xf32> to vector<16x8xf32>
    %95 = vector.shape_cast %91 : vector<16x8xf32> to vector<1x16x8xf32>
    %96 = vector.shape_cast %92 : vector<16x8xf32> to vector<1x16x8xf32>
    %97 = vector.shape_cast %93 : vector<16x8xf32> to vector<1x16x8xf32>
    %98 = vector.shape_cast %94 : vector<16x8xf32> to vector<1x16x8xf32>
    %99 = tpu.concatenate %95, %96, %97, %98 in 0 : vector<1x16x8xf32>, vector<1x16x8xf32>, vector<1x16x8xf32>, vector<1x16x8xf32> -> vector<4x16x8xf32>
    %100 = vector.extract_strided_slice %81 {offsets = [0, 0], sizes = [16, 8], strides = [1, 1]} : vector<16x32xf32> to vector<16x8xf32>
    %101 = vector.extract_strided_slice %81 {offsets = [0, 8], sizes = [16, 8], strides = [1, 1]} : vector<16x32xf32> to vector<16x8xf32>
    %102 = vector.extract_strided_slice %81 {offsets = [0, 16], sizes = [16, 8], strides = [1, 1]} : vector<16x32xf32> to vector<16x8xf32>
    %103 = vector.extract_strided_slice %81 {offsets = [0, 24], sizes = [16, 8], strides = [1, 1]} : vector<16x32xf32> to vector<16x8xf32>
    %104 = vector.shape_cast %100 : vector<16x8xf32> to vector<1x16x8xf32>
    %105 = vector.shape_cast %101 : vector<16x8xf32> to vector<1x16x8xf32>
    %106 = vector.shape_cast %102 : vector<16x8xf32> to vector<1x16x8xf32>
    %107 = vector.shape_cast %103 : vector<16x8xf32> to vector<1x16x8xf32>
    %108 = tpu.concatenate %104, %105, %106, %107 in 0 : vector<1x16x8xf32>, vector<1x16x8xf32>, vector<1x16x8xf32>, vector<1x16x8xf32> -> vector<4x16x8xf32>
    "tpu.trace_start"() <{level = 10 : i32, message = "hqd,hkd->hqk"}> : () -> ()
    %cst_49 = arith.constant dense<0.000000e+00> : vector<4x16x16xf32>
    %109 = tpu.matmul %90, %99, %cst_49 {dimension_numbers = #tpu.dot_dimension_numbers<[2], [2], [1], [1], [0, 0, 0, 1, 1, 1], [0], [0]>} : vector<4x16x8xf32>, vector<4x16x8xf32>, vector<4x16x16xf32> -> vector<4x16x16xf32>
    "tpu.trace_stop"() : () -> ()
    %cst_50 = arith.constant 0.353553385 : f32
    %110 = vector.broadcast %cst_50 : f32 to vector<4x16x16xf32>
    %111 = arith.mulf %109, %110 : vector<4x16x16xf32>
    %112 = vector.shape_cast %41 : vector<16x16xf32> to vector<1x16x16xf32>
    %113 = vector.broadcast %112 : vector<1x16x16xf32> to vector<4x16x16xf32>
    %114 = arith.addf %111, %113 : vector<4x16x16xf32>
    %cst_51 = arith.constant dense<0xFF800000> : vector<4x16xf32>
    %115 = vector.multi_reduction <maximumf>, %114, %cst_51 [2] : vector<4x16x16xf32> to vector<4x16xf32>
    %116 = vector.shape_cast %115 : vector<4x16xf32> to vector<4x16x1xf32>
    %117 = vector.broadcast %116 : vector<4x16x1xf32> to vector<4x16x16xf32>
    %118 = arith.subf %114, %117 : vector<4x16x16xf32>
    %119 = math.exp %118 : vector<4x16x16xf32>
    %cst_52 = arith.constant dense<0.000000e+00> : vector<4x16xf32>
    %120 = vector.multi_reduction <add>, %119, %cst_52 [2] : vector<4x16x16xf32> to vector<4x16xf32>
    %121 = vector.shape_cast %120 : vector<4x16xf32> to vector<4x16x1xf32>
    %122 = tpu.reciprocal %121 {approx = true} : vector<4x16x1xf32> -> vector<4x16x1xf32>
    %123 = vector.broadcast %122 : vector<4x16x1xf32> to vector<4x16x16xf32>
    %124 = arith.mulf %119, %123 : vector<4x16x16xf32>
    "tpu.trace_start"() <{level = 10 : i32, message = "hqk,hkd->hqd"}> : () -> ()
    %cst_53 = arith.constant dense<0.000000e+00> : vector<4x16x8xf32>
    %125 = tpu.matmul %124, %108, %cst_53 {dimension_numbers = #tpu.dot_dimension_numbers<[2], [1], [1], [2], [0, 0, 0, 1, 1, 2], [0], [0]>} : vector<4x16x16xf32>, vector<4x16x8xf32>, vector<4x16x8xf32> -> vector<4x16x8xf32>
    "tpu.trace_stop"() : () -> ()
    "tpu.trace_start"() <{level = 10 : i32, message = "hqd,hde->hqe"}> : () -> ()
    %cst_54 = arith.constant dense<0.000000e+00> : vector<4x16x32xf32>
    %126 = tpu.matmul %125, %9, %cst_54 {dimension_numbers = #tpu.dot_dimension_numbers<[2], [1], [1], [2], [0, 0, 0, 1, 1, 2], [0], [0]>} : vector<4x16x8xf32>, vector<4x8x32xf32>, vector<4x16x32xf32> -> vector<4x16x32xf32>
    "tpu.trace_stop"() : () -> ()
    %cst_55 = arith.constant dense<0.000000e+00> : vector<16x32xf32>
    %127 = vector.multi_reduction <add>, %126, %cst_55 [0] : vector<4x16x32xf32> to vector<16x32xf32>
    %128 = vector.broadcast %15 : vector<1x32xf32> to vector<16x32xf32>
    %129 = arith.addf %127, %128 : vector<16x32xf32>
    %130 = arith.addf %1, %129 : vector<16x32xf32>
    %cst_56 = arith.constant dense<0.000000e+00> : vector<16xf32>
    %131 = vector.multi_reduction <add>, %130, %cst_56 [1] : vector<16x32xf32> to vector<16xf32>
    %132 = vector.shape_cast %131 : vector<16xf32> to vector<16x1xf32>
    %cst_57 = arith.constant 3.200000e+01 : f32
    %133 = vector.broadcast %cst_57 : f32 to vector<16x1xf32>
    %134 = arith.divf %132, %133 : vector<16x1xf32>
    %135 = vector.broadcast %134 : vector<16x1xf32> to vector<16x32xf32>
    %136 = arith.subf %130, %135 : vector<16x32xf32>
    %137 = arith.mulf %136, %136 : vector<16x32xf32>
    %cst_58 = arith.constant dense<0.000000e+00> : vector<16xf32>
    %138 = vector.multi_reduction <add>, %137, %cst_58 [1] : vector<16x32xf32> to vector<16xf32>
    %139 = vector.shape_cast %138 : vector<16xf32> to vector<16x1xf32>
    %cst_59 = arith.constant 3.200000e+01 : f32
    %140 = vector.broadcast %cst_59 : f32 to vector<16x1xf32>
    %141 = arith.divf %139, %140 : vector<16x1xf32>
    %cst_60 = arith.constant 9.99999974E-6 : f32
    %142 = vector.broadcast %cst_60 : f32 to vector<16x1xf32>
    %143 = arith.addf %141, %142 : vector<16x1xf32>
    %144 = math.rsqrt %143 : vector<16x1xf32>
    %145 = vector.broadcast %144 : vector<16x1xf32> to vector<16x32xf32>
    %146 = arith.mulf %136, %145 : vector<16x32xf32>
    %147 = vector.broadcast %16 : vector<1x32xf32> to vector<16x32xf32>
    %148 = arith.mulf %146, %147 : vector<16x32xf32>
    %149 = vector.broadcast %17 : vector<1x32xf32> to vector<16x32xf32>
    %150 = arith.addf %148, %149 : vector<16x32xf32>
    %cst_61 = arith.constant dense<0.000000e+00> : vector<16x32xf32>
    %151 = tpu.matmul %150, %3, %cst_61 {dimension_numbers = #tpu.dot_dimension_numbers<[1], [0], [0], [1], [0, 0, 1, 1], [], []>} : vector<16x32xf32>, vector<32x32xf32>, vector<16x32xf32> -> vector<16x32xf32>
    %152 = vector.broadcast %18 : vector<1x32xf32> to vector<16x32xf32>
    %153 = arith.addf %151, %152 : vector<16x32xf32>
    %cst_62 = arith.constant dense<0.000000e+00> : vector<32x64xf32>
    %154 = tpu.matmul %0, %4, %cst_62 {dimension_numbers = #tpu.dot_dimension_numbers<[1], [0], [0], [1], [0, 0, 1, 1], [], []>} : vector<32x32xf32>, vector<32x64xf32>, vector<32x64xf32> -> vector<32x64xf32>
    %155 = vector.broadcast %19 : vector<1x64xf32> to vector<32x64xf32>
    %156 = arith.addf %154, %155 : vector<32x64xf32>
    %157 = vector.extract_strided_slice %156 {offsets = [0, 0], sizes = [32, 32], strides = [1, 1]} : vector<32x64xf32> to vector<32x32xf32>
    %158 = vector.extract_strided_slice %156 {offsets = [0, 32], sizes = [32, 32], strides = [1, 1]} : vector<32x64xf32> to vector<32x32xf32>
    %159 = vector.extract_strided_slice %153 {offsets = [0, 0], sizes = [16, 8], strides = [1, 1]} : vector<16x32xf32> to vector<16x8xf32>
    %160 = vector.extract_strided_slice %153 {offsets = [0, 8], sizes = [16, 8], strides = [1, 1]} : vector<16x32xf32> to vector<16x8xf32>
    %161 = vector.extract_strided_slice %153 {offsets = [0, 16], sizes = [16, 8], strides = [1, 1]} : vector<16x32xf32> to vector<16x8xf32>
    %162 = vector.extract_strided_slice %153 {offsets = [0, 24], sizes = [16, 8], strides = [1, 1]} : vector<16x32xf32> to vector<16x8xf32>
    %163 = vector.shape_cast %159 : vector<16x8xf32> to vector<1x16x8xf32>
    %164 = vector.shape_cast %160 : vector<16x8xf32> to vector<1x16x8xf32>
    %165 = vector.shape_cast %161 : vector<16x8xf32> to vector<1x16x8xf32>
    %166 = vector.shape_cast %162 : vector<16x8xf32> to vector<1x16x8xf32>
    %167 = tpu.concatenate %163, %164, %165, %166 in 0 : vector<1x16x8xf32>, vector<1x16x8xf32>, vector<1x16x8xf32>, vector<1x16x8xf32> -> vector<4x16x8xf32>
    %168 = vector.extract_strided_slice %157 {offsets = [0, 0], sizes = [32, 8], strides = [1, 1]} : vector<32x32xf32> to vector<32x8xf32>
    %169 = vector.extract_strided_slice %157 {offsets = [0, 8], sizes = [32, 8], strides = [1, 1]} : vector<32x32xf32> to vector<32x8xf32>
    %170 = vector.extract_strided_slice %157 {offsets = [0, 16], sizes = [32, 8], strides = [1, 1]} : vector<32x32xf32> to vector<32x8xf32>
    %171 = vector.extract_strided_slice %157 {offsets = [0, 24], sizes = [32, 8], strides = [1, 1]} : vector<32x32xf32> to vector<32x8xf32>
    %172 = vector.shape_cast %168 : vector<32x8xf32> to vector<1x32x8xf32>
    %173 = vector.shape_cast %169 : vector<32x8xf32> to vector<1x32x8xf32>
    %174 = vector.shape_cast %170 : vector<32x8xf32> to vector<1x32x8xf32>
    %175 = vector.shape_cast %171 : vector<32x8xf32> to vector<1x32x8xf32>
    %176 = tpu.concatenate %172, %173, %174, %175 in 0 : vector<1x32x8xf32>, vector<1x32x8xf32>, vector<1x32x8xf32>, vector<1x32x8xf32> -> vector<4x32x8xf32>
    %177 = vector.extract_strided_slice %158 {offsets = [0, 0], sizes = [32, 8], strides = [1, 1]} : vector<32x32xf32> to vector<32x8xf32>
    %178 = vector.extract_strided_slice %158 {offsets = [0, 8], sizes = [32, 8], strides = [1, 1]} : vector<32x32xf32> to vector<32x8xf32>
    %179 = vector.extract_strided_slice %158 {offsets = [0, 16], sizes = [32, 8], strides = [1, 1]} : vector<32x32xf32> to vector<32x8xf32>
    %180 = vector.extract_strided_slice %158 {offsets = [0, 24], sizes = [32, 8], strides = [1, 1]} : vector<32x32xf32> to vector<32x8xf32>
    %181 = vector.shape_cast %177 : vector<32x8xf32> to vector<1x32x8xf32>
    %182 = vector.shape_cast %178 : vector<32x8xf32> to vector<1x32x8xf32>
    %183 = vector.shape_cast %179 : vector<32x8xf32> to vector<1x32x8xf32>
    %184 = vector.shape_cast %180 : vector<32x8xf32> to vector<1x32x8xf32>
    %185 = tpu.concatenate %181, %182, %183, %184 in 0 : vector<1x32x8xf32>, vector<1x32x8xf32>, vector<1x32x8xf32>, vector<1x32x8xf32> -> vector<4x32x8xf32>
    "tpu.trace_start"() <{level = 10 : i32, message = "hqd,hkd->hqk"}> : () -> ()
    %cst_63 = arith.constant dense<0.000000e+00> : vector<4x16x32xf32>
    %186 = tpu.matmul %167, %176, %cst_63 {dimension_numbers = #tpu.dot_dimension_numbers<[2], [2], [1], [1], [0, 0, 0, 1, 1, 1], [0], [0]>} : vector<4x16x8xf32>, vector<4x32x8xf32>, vector<4x16x32xf32> -> vector<4x16x32xf32>
    "tpu.trace_stop"() : () -> ()
    %cst_64 = arith.constant 0.353553385 : f32
    %187 = vector.broadcast %cst_64 : f32 to vector<4x16x32xf32>
    %188 = arith.mulf %186, %187 : vector<4x16x32xf32>
    %189 = vector.shape_cast %55 : vector<16x32xf32> to vector<1x16x32xf32>
    %190 = vector.broadcast %189 : vector<1x16x32xf32> to vector<4x16x32xf32>
    %191 = arith.addf %188, %190 : vector<4x16x32xf32>
    %cst_65 = arith.constant dense<0xFF800000> : vector<4x16xf32>
    %192 = vector.multi_reduction <maximumf>, %191, %cst_65 [2] : vector<4x16x32xf32> to vector<4x16xf32>
    %193 = vector.shape_cast %192 : vector<4x16xf32> to vector<4x16x1xf32>
    %194 = vector.broadcast %193 : vector<4x16x1xf32> to vector<4x16x32xf32>
    %195 = arith.subf %191, %194 : vector<4x16x32xf32>
    %196 = math.exp %195 : vector<4x16x32xf32>
    %cst_66 = arith.constant dense<0.000000e+00> : vector<4x16xf32>
    %197 = vector.multi_reduction <add>, %196, %cst_66 [2] : vector<4x16x32xf32> to vector<4x16xf32>
    %198 = vector.shape_cast %197 : vector<4x16xf32> to vector<4x16x1xf32>
    %199 = tpu.reciprocal %198 {approx = true} : vector<4x16x1xf32> -> vector<4x16x1xf32>
    %200 = vector.broadcast %199 : vector<4x16x1xf32> to vector<4x16x32xf32>
    %201 = arith.mulf %196, %200 : vector<4x16x32xf32>
    "tpu.trace_start"() <{level = 10 : i32, message = "hqk,hkd->hqd"}> : () -> ()
    %cst_67 = arith.constant dense<0.000000e+00> : vector<4x16x8xf32>
    %202 = tpu.matmul %201, %185, %cst_67 {dimension_numbers = #tpu.dot_dimension_numbers<[2], [1], [1], [2], [0, 0, 0, 1, 1, 2], [0], [0]>} : vector<4x16x32xf32>, vector<4x32x8xf32>, vector<4x16x8xf32> -> vector<4x16x8xf32>
    "tpu.trace_stop"() : () -> ()
    "tpu.trace_start"() <{level = 10 : i32, message = "hqd,hde->hqe"}> : () -> ()
    %cst_68 = arith.constant dense<0.000000e+00> : vector<4x16x32xf32>
    %203 = tpu.matmul %202, %11, %cst_68 {dimension_numbers = #tpu.dot_dimension_numbers<[2], [1], [1], [2], [0, 0, 0, 1, 1, 2], [0], [0]>} : vector<4x16x8xf32>, vector<4x8x32xf32>, vector<4x16x32xf32> -> vector<4x16x32xf32>
    "tpu.trace_stop"() : () -> ()
    %cst_69 = arith.constant dense<0.000000e+00> : vector<16x32xf32>
    %204 = vector.multi_reduction <add>, %203, %cst_69 [0] : vector<4x16x32xf32> to vector<16x32xf32>
    %205 = vector.broadcast %20 : vector<1x32xf32> to vector<16x32xf32>
    %206 = arith.addf %204, %205 : vector<16x32xf32>
    %207 = arith.addf %130, %206 : vector<16x32xf32>
    %cst_70 = arith.constant dense<0.000000e+00> : vector<16xf32>
    %208 = vector.multi_reduction <add>, %207, %cst_70 [1] : vector<16x32xf32> to vector<16xf32>
    %209 = vector.shape_cast %208 : vector<16xf32> to vector<16x1xf32>
    %cst_71 = arith.constant 3.200000e+01 : f32
    %210 = vector.broadcast %cst_71 : f32 to vector<16x1xf32>
    %211 = arith.divf %209, %210 : vector<16x1xf32>
    %212 = vector.broadcast %211 : vector<16x1xf32> to vector<16x32xf32>
    %213 = arith.subf %207, %212 : vector<16x32xf32>
    %214 = arith.mulf %213, %213 : vector<16x32xf32>
    %cst_72 = arith.constant dense<0.000000e+00> : vector<16xf32>
    %215 = vector.multi_reduction <add>, %214, %cst_72 [1] : vector<16x32xf32> to vector<16xf32>
    %216 = vector.shape_cast %215 : vector<16xf32> to vector<16x1xf32>
    %cst_73 = arith.constant 3.200000e+01 : f32
    %217 = vector.broadcast %cst_73 : f32 to vector<16x1xf32>
    %218 = arith.divf %216, %217 : vector<16x1xf32>
    %cst_74 = arith.constant 9.99999974E-6 : f32
    %219 = vector.broadcast %cst_74 : f32 to vector<16x1xf32>
    %220 = arith.addf %218, %219 : vector<16x1xf32>
    %221 = math.rsqrt %220 : vector<16x1xf32>
    %222 = vector.broadcast %221 : vector<16x1xf32> to vector<16x32xf32>
    %223 = arith.mulf %213, %222 : vector<16x32xf32>
    %224 = vector.broadcast %21 : vector<1x32xf32> to vector<16x32xf32>
    %225 = arith.mulf %223, %224 : vector<16x32xf32>
    %226 = vector.broadcast %22 : vector<1x32xf32> to vector<16x32xf32>
    %227 = arith.addf %225, %226 : vector<16x32xf32>
    %cst_75 = arith.constant dense<0.000000e+00> : vector<16x128xf32>
    %228 = tpu.matmul %227, %5, %cst_75 {dimension_numbers = #tpu.dot_dimension_numbers<[1], [0], [0], [1], [0, 0, 1, 1], [], []>} : vector<16x32xf32>, vector<32x128xf32>, vector<16x128xf32> -> vector<16x128xf32>
    %229 = vector.broadcast %23 : vector<1x128xf32> to vector<16x128xf32>
    %230 = arith.addf %228, %229 : vector<16x128xf32>
    %231 = arith.mulf %230, %230 : vector<16x128xf32>
    %232 = arith.mulf %230, %231 : vector<16x128xf32>
    %cst_76 = arith.constant 4.471500e-02 : f32
    %233 = vector.broadcast %cst_76 : f32 to vector<16x128xf32>
    %234 = arith.mulf %233, %232 : vector<16x128xf32>
    %235 = arith.addf %230, %234 : vector<16x128xf32>
    %cst_77 = arith.constant 0.797884583 : f32
    %236 = vector.broadcast %cst_77 : f32 to vector<16x128xf32>
    %237 = arith.mulf %236, %235 : vector<16x128xf32>
    %238 = math.tanh %237 : vector<16x128xf32>
    %cst_78 = arith.constant 1.000000e+00 : f32
    %239 = vector.broadcast %cst_78 : f32 to vector<16x128xf32>
    %240 = arith.addf %239, %238 : vector<16x128xf32>
    %cst_79 = arith.constant 5.000000e-01 : f32
    %241 = vector.broadcast %cst_79 : f32 to vector<16x128xf32>
    %242 = arith.mulf %241, %240 : vector<16x128xf32>
    %243 = arith.mulf %230, %242 : vector<16x128xf32>
    %cst_80 = arith.constant dense<0.000000e+00> : vector<16x32xf32>
    %244 = tpu.matmul %243, %7, %cst_80 {dimension_numbers = #tpu.dot_dimension_numbers<[1], [0], [0], [1], [0, 0, 1, 1], [], []>} : vector<16x128xf32>, vector<128x32xf32>, vector<16x32xf32> -> vector<16x32xf32>
    %245 = arith.addf %207, %244 : vector<16x32xf32>
    %246 = vector.broadcast %24 : vector<1x32xf32> to vector<16x32xf32>
    %247 = arith.addf %245, %246 : vector<16x32xf32>
    %cst_81 = arith.constant dense<0.000000e+00> : vector<16xf32>
    %248 = vector.multi_reduction <add>, %247, %cst_81 [1] : vector<16x32xf32> to vector<16xf32>
    %249 = vector.shape_cast %248 : vector<16xf32> to vector<16x1xf32>
    %cst_82 = arith.constant 3.200000e+01 : f32
    %250 = vector.broadcast %cst_82 : f32 to vector<16x1xf32>
    %251 = arith.divf %249, %250 : vector<16x1xf32>
    %252 = vector.broadcast %251 : vector<16x1xf32> to vector<16x32xf32>
    %253 = arith.subf %247, %252 : vector<16x32xf32>
    %254 = arith.mulf %253, %253 : vector<16x32xf32>
    %cst_83 = arith.constant dense<0.000000e+00> : vector<16xf32>
    %255 = vector.multi_reduction <add>, %254, %cst_83 [1] : vector<16x32xf32> to vector<16xf32>
    %256 = vector.shape_cast %255 : vector<16xf32> to vector<16x1xf32>
    %cst_84 = arith.constant 3.200000e+01 : f32
    %257 = vector.broadcast %cst_84 : f32 to vector<16x1xf32>
    %258 = arith.divf %256, %257 : vector<16x1xf32>
    %cst_85 = arith.constant 9.99999974E-6 : f32
    %259 = vector.broadcast %cst_85 : f32 to vector<16x1xf32>
    %260 = arith.addf %258, %259 : vector<16x1xf32>
    %261 = math.rsqrt %260 : vector<16x1xf32>
    %262 = vector.broadcast %261 : vector<16x1xf32> to vector<16x32xf32>
    %263 = arith.mulf %253, %262 : vector<16x32xf32>
    %264 = vector.broadcast %25 : vector<1x32xf32> to vector<16x32xf32>
    %265 = arith.mulf %263, %264 : vector<16x32xf32>
    %266 = vector.broadcast %26 : vector<1x32xf32> to vector<16x32xf32>
    %267 = arith.addf %265, %266 : vector<16x32xf32>
    %cst_86 = arith.constant dense<0.000000e+00> : vector<16x128xf32>
    %268 = tpu.matmul %267, %6, %cst_86 {dimension_numbers = #tpu.dot_dimension_numbers<[1], [0], [0], [1], [0, 0, 1, 1], [], []>} : vector<16x32xf32>, vector<32x128xf32>, vector<16x128xf32> -> vector<16x128xf32>
    %269 = vector.broadcast %27 : vector<1x128xf32> to vector<16x128xf32>
    %270 = arith.addf %268, %269 : vector<16x128xf32>
    %c0_87 = arith.constant 0 : index
    %c0_88 = arith.constant 0 : index
    %271 = vector.load %arg6[%c0_87, %c0_88] : memref<16x128xf32, #tpu.memory_space<vmem>>, vector<16x128xf32>
    tpu.vector_store %arg6[%c0_87, %c0_88], %270 {strides = array<i32>} : memref<16x128xf32, #tpu.memory_space<vmem>>, vector<16x128xf32>,
    return
  }
}

</mosaic_0001>

<bundles_post_ra>
// kernel: tpu_custom_call.1
= control target key start
LH: loop header
LB: loop body
LE: loop exit
PB: predicated region body
PF: predicated region fallthrough
CT: control target
= control target key end

     0   :  { %11 = vsyncpa [#allocation3], 0  ;;  %s4916_s0 = inlined_call_operand.hbm [shape: f32[32,32], index: 0, kind: input, shape index: {}]   ;;  %s4917_s1 = inlined_call_operand.hbm [shape: f32[16,32], index: 1, kind: input, shape index: {}]   ;;  %s4918_s2 = inlined_call_operand.vmem [shape: f32[32,640], index: 2, kind: input, shape index: {}]   ;;  %s4919_s3 = inlined_call_operand.vmem [shape: f32[128,32], index: 3, kind: input, shape index: {}]   ;;  %s4920_s4 = inlined_call_operand.hbm [shape: f32[2,4,8,32], index: 4, kind: input, shape index: {}]   ;;  %s4921_s5 = inlined_call_operand.vmem [shape: f32[16,128], index: 5, kind: input, shape index: {}]   ;;  %s4922_s6 = inlined_call_operand.hbm [shape: f32[16,128], index: 6, kind: output, shape index: {}]  }
   0x1   :  { %12 = vsyncpa [#allocation6], 0 }
   0x2   :  { %13 = vsyncpa [#allocation4], 0  ;;  %s4269_s21 = smov [#allocation5]   ;;  %s4270_s23 = smov [#allocation2]  }
   0x3   :  { %s31_s22 = sshll.u32 %s4269_s21, 4  ;;  %s19_s24 = sshll.u32 %s4270_s23, 4  ;;  %s32_s22 = int_to_ptr.vmem [resolvable:$true] %s31_s22  ;;  %s4316_s24 = int_to_ptr.vmem [resolvable:$true] %s19_s24 }
   0x4   :  { %s4175_s27 = scalar_lea.hbm %s4917_s1, 256 }
   0x5   :  { %p4176_p0 = scmp.ne.s32.totalorder %s4917_s1, %s4175_s27  ;;  %p4179_p1 = scmp.lt.u32.totalorder %s4175_s27, %s4917_s1 }
   0x7   :  { %p4181_p2 = pnand %p4179_p1, %p4176_p0 }
   0x9   :  { %4184 = shalt.err (!%p4181_p2)
}
   0xa   :  { %s4185_s8 = scalar_lea.vmem %s32_s22, 256  ;;  %p4190_p4 = scmp.lt.s32.totalorder %s32_s22, %s32_s22 }
   0xb   :  { %p4186_p3 = scmp.ne.s32.totalorder %s32_s22, %s4185_s8  ;;  %p4191_p5 = scmp.lt.s32.totalorder %s4185_s8, %s4185_s8 }
   0xd   :  { %p4192_p6 = por %p4191_p5, %p4190_p4 }
   0xf   :  { %p4193_p7 = pnand %p4192_p6, %p4186_p3 }
  0x11   :  { %4196 = shalt.err (!%p4193_p7)
}
  0x12   :  { %s4271_s9 = smov 128   ;;  %s4272_s10 = smov 8  }
  0x13   :  { %37 = dma.hbm_to_vmem [thread:$0]  %s4917_s1, 256, %s32_s22, [#allocation6], %s4271_s9, %s4271_s9, %s4272_s10  }
  0x14   :  { %s4197_s15 = scalar_lea.hbm %s4916_s0, 512 }
  0x15   :  { %p4198_p8 = scmp.ne.s32.totalorder %s4916_s0, %s4197_s15  ;;  %p4201_p9 = scmp.lt.u32.totalorder %s4197_s15, %s4916_s0 }
  0x17   :  { %p4203_p10 = pnand %p4201_p9, %p4198_p8 }
  0x19   :  { %4206 = shalt.err (!%p4203_p10)
}
  0x1a   :  { %s4207_s20 = scalar_lea.vmem %s4316_s24, 512  ;;  %p4212_p12 = scmp.lt.s32.totalorder %s4316_s24, %s4316_s24 }
  0x1b   :  { %p4208_p11 = scmp.ne.s32.totalorder %s4316_s24, %s4207_s20  ;;  %p4213_p13 = scmp.lt.s32.totalorder %s4207_s20, %s4207_s20 }
  0x1d   :  { %p4214_p0 = por %p4213_p13, %p4212_p12 }
  0x1f   :  { %p4215_p1 = pnand %p4214_p0, %p4208_p11 }
  0x21   :  { %4218 = shalt.err (!%p4215_p1)
}
  0x22   :  { %25 = dma.hbm_to_vmem [thread:$0]  %s4916_s0, 512, %s4316_s24, [#allocation3], %s4271_s9, %s4271_s9, %s4272_s10  }
  0x23   :  { %s4273_s22 = smov [#allocation7]   ;;  %s4219_s27 = scalar_lea.hbm %s4920_s4, 1024 }
  0x24   :  { %s47_s23 = sshll.u32 %s4273_s22, 4  ;;  %p4220_p2 = scmp.ne.s32.totalorder %s4920_s4, %s4219_s27  ;;  %s48_s23 = int_to_ptr.vmem [resolvable:$true] %s47_s23 }
  0x25   :  { %p4223_p3 = scmp.lt.u32.totalorder %s4219_s27, %s4920_s4 }
  0x27   :  { %p4225_p4 = pnand %p4223_p3, %p4220_p2 }
  0x29   :  { %4228 = shalt.err (!%p4225_p4)
}
  0x2a   :  { %s4229_s8 = scalar_lea.vmem %s48_s23, 1024  ;;  %p4234_p6 = scmp.lt.s32.totalorder %s48_s23, %s48_s23 }
  0x2b   :  { %p4230_p5 = scmp.ne.s32.totalorder %s48_s23, %s4229_s8  ;;  %p4235_p7 = scmp.lt.s32.totalorder %s4229_s8, %s4229_s8 }
  0x2d   :  { %p4236_p8 = por %p4235_p7, %p4234_p6 }
  0x2f   :  { %p4237_p9 = pnand %p4236_p8, %p4230_p5 }
  0x31   :  { %4240 = shalt.err (!%p4237_p9)
}
  0x32   :  { %53 = dma.hbm_to_vmem [thread:$0]  %s4920_s4, 1024, %s48_s23, [#allocation6], %s4271_s9, %s4271_s9, %s4272_s10  }
  0x33   :  { %4263 = dma.done.wait [#allocation3], 512  }
  0x34   :  { %4264 = vsyncadd [#allocation3], 4294966784 }
  0x35   :  { %4265 = dma.done.wait [#allocation6], 1280  }
  0x36   :  { %4266 = vsyncadd [#allocation6], 4294966016  ;;  %vm156_vm0 = vcmask 261120   ;;  %v4368_v0 = vld [vmem:[#allocation5] sm:$0xff]  ;;  %v4370_v1 = vld [vmem:[#allocation5 + $0x8] sm:$0xff]  ;;  %vm299_vm1 = vcmask 64512  }
  0x37   :  { %v157_v2 = vsel %vm156_vm0, %v4368_v0, 0.0  ;;  %v160_v3 = vsel %vm156_vm0, %v4370_v1, 0.0  ;;  %v71_v14 = vld [vmem:[%s4918_s2] sm:$0xff]  ;;  %v72_v15 = vld [vmem:[%s4918_s2 + $0x28] sm:$0xff]  ;;  %v73_v16 = vld [vmem:[%s4918_s2 + $0x50] sm:$0xff]  ;;  %s4274_s23 = smov 120  }
  0x38   :  { %158 = vadd.xlane.f32.xlu0 %v157_v2  ;;  %v3777_v17 = vpack.c.bf16 %v72_v15, %v71_v14  ;;  %v74_v18 = vld [vmem:[%s4918_s2 + $0x78] sm:$0xff]  ;;  %v3246_v27 = vld [vmem:[%s4921_s5] ss:$0 sm:$0xff]  ;;  %v3247_v29 = vld [vmem:[%s4921_s5 + $0x1] ss:$0 sm:$0xff]  ;;  %s4275_s25 = smov 112  }
  0x39   :  { %v3781_v19 = vpack.c.bf16 %v74_v18, %v73_v16  ;;  %v3248_v36 = vld [vmem:[%s4921_s5 + $0x2] ss:$0 sm:$0xff]  ;;  %s4276_s26 = smov 104   ;;  %s4277_s27 = smov 96   ;;  %vm4425_vm2 = vmpackc.low %vm299_vm1, %vm299_vm1  ;;  %vm660_vm5 = vcmask 130048  }
  0x3a   :  { %3778 = vmatprep.subr.bf16.mxu0 %v3777_v17  ;;  %s4279_s28 = smov 64   ;;  %s4280_s17 = smov [#allocation8]  }
  0x3b   :  { %3780 = vmatpush3.bf16.msra.mxu0 %v3777_v17  ;;  %s3233_s18 = sshll.u32 %s4280_s17, 4  ;;  %s3234_s18 = int_to_ptr.vmem [resolvable:$true] %s3233_s18 }
  0x3c   :  { %161 = vadd.xlane.f32.xlu0 %v160_v3  ;;  %3782 = vmatprep.subr.bf16.mxu0 %v3781_v19  ;;  %s4241_s19 = scalar_lea.vmem %s3234_s18, 256  ;;  %p4246_p11 = scmp.lt.s32.totalorder %s3234_s18, %s3234_s18 }
  0x3d   :  { %p4242_p10 = scmp.ne.s32.totalorder %s3234_s18, %s4241_s19  ;;  %p4247_p12 = scmp.lt.s32.totalorder %s4241_s19, %s4241_s19 }
  0x3f   :  { %3784 = vmatpush3.bf16.msra.mxu0 %v3781_v19  ;;  %p4248_p13 = por %p4247_p12, %p4246_p11 }
  0x41   :  { %p4249_p0 = pnand %p4248_p13, %p4242_p10 }
  0xc5   :  { %v159_v4 = vpop.xlane.xlu0 %158 }
  0xc6   :  { %v164_v5 = vmul.f32 0.03125, %v159_v4 }
  0xc8   :  { %v166_v6 = vsub.f32 %v4368_v0, %v164_v5 }
  0xc9   :  { %v162_v7 = vpop.xlane.xlu0 %161 }
  0xca   :  { %v165_v8 = vmul.f32 0.03125, %v162_v7  ;;  %v168_v9 = vmul.f32 %v166_v6, %v166_v6 }
  0xcc   :  { %v167_v10 = vsub.f32 %v4370_v1, %v165_v8  ;;  %v170_v11 = vsel %vm156_vm0, %v168_v9, 0.0 }
  0xcd   :  { %171 = vadd.xlane.f32.xlu1 %v170_v11 }
  0xce   :  { %v169_v12 = vmul.f32 %v167_v10, %v167_v10 }
  0xd0   :  { %v173_v13 = vsel %vm156_vm0, %v169_v12, 0.0 }
  0xd1   :  { %174 = vadd.xlane.f32.xlu1 %v173_v13 }
 0x15a   :  { %v172_v20 = vpop.xlane.xlu1 %171 }
 0x15b   :  { %v176_v21 = vmul.f32 0.03125, %v172_v20  ;;  %v4278_v20 = vmov -1e+30  }
 0x15d   :  { %v178_v22 = vadd.f32 1e-05, %v176_v21 }
 0x15e   :  { %v175_v23 = vpop.xlane.xlu1 %174 }
 0x15f   :  { %4091 = vrsqrt.f32 %v178_v22  ;;  %v177_v24 = vmul.f32 0.03125, %v175_v23 }
 0x161   :  { %v179_v25 = vadd.f32 1e-05, %v177_v24 }
 0x163   :  { %4093 = vrsqrt.f32 %v179_v25 }
 0x169   :  { %v4092_v26 = vpop.eup %4091 }
 0x16a   :  { %v182_v28 = vmul.f32 %v4092_v26, %v166_v6  ;;  %v132_v6 = vlaneseq }
 0x16c   :  { %v188_v30 = vmul.f32 %v3246_v27, %v182_v28  ;;  %v133_v7 = vshrl.u32 %v132_v6, 7  ;;  %v4455_v9 = vand.u32 127, %v132_v6 }
 0x16d   :  { %v4094_v31 = vpop.eup %4093 }
 0x16e   :  { %v183_v32 = vmul.f32 %v4094_v31, %v167_v10  ;;  %v194_v33 = vadd.f32 %v3247_v29, %v188_v30  ;;  %v134_v8 = vadd.s32 8, %v133_v7  ;;  %v139_v11 = vcvt.s32.f32 %v4455_v9 }
 0x16f   :  { %v135_v12 = vcvt.s32.f32 %v133_v7 }
 0x170   :  { %v189_v34 = vmul.f32 %v3246_v27, %v183_v32  ;;  %3508 = vmatprep.mubr.msk.f32.mxu0 %vm156_vm0, %v194_v33  ;;  %v136_v10 = vcvt.s32.f32 %v134_v8  ;;  %v144_v14 = vmul.f32 0.125, %v139_v11 }
 0x171   :  { %v4462_v15 = vmul.f32 0.125, %v135_v12 }
 0x172   :  { %v195_v35 = vadd.f32 %v3247_v29, %v189_v34  ;;  %v4458_v13 = vmul.f32 0.125, %v136_v10  ;;  %v145_v17 = vfloor.f32 %v144_v14 }
 0x173   :  { %v142_v18 = vfloor.f32 %v4462_v15 }
 0x174   :  { %3509 = vmatmul.mubr.msk.f32.vlgmr.msra.gmra.mrb[0].mxu0 %vm156_vm0, %v195_v35  ;;  %v143_v16 = vfloor.f32 %v4458_v13 }
 0x175   :  { %vm146_vm4 = vcmp.eq.f32.partialorder %v142_v18, %v145_v17 }
 0x176   :  { %vm147_vm3 = vcmp.eq.f32.partialorder %v143_v16, %v145_v17  ;;  %v148_v24 = vsel %vm146_vm4, 0.0, %v4278_v20 }
 0x177   :  { %v149_v21 = vsel %vm147_vm3, 0.0, %v4278_v20 }
 0x247   :  { %v3510_v37 = vpop.f32.mrb[0].mxu0 }
 0x248   :  { %v278_v38 = vadd.f32 %v3510_v37, %v3248_v36  ;;  %v272_v39 = vpop.f32.mrb[1].mxu0 }
 0x249   :  { %v273_v40 = vadd.f32 %v3248_v36, %v272_v39 }
 0x24a   :  { %285 = vrot.lane.b32.xlu1 %v278_v38, %s4274_s23 }
 0x24b   :  { %283 = vrot.lane.b32.xlu0 %v273_v40, %s4274_s23  ;;  %3515 = vmatprep.mubr.msk.f32.mxu0 %vm299_vm1, %v273_v40  ;;  %v4408_v41 = vpack.i.bf16 %v278_v38, %v273_v40 }
 0x24e   :  { %289 = vrot.lane.b32.xlu1 %v278_v38, %s4275_s25 }
 0x24f   :  { %291 = vrot.lane.b32.xlu0 %v273_v40, %s4276_s26 }
 0x252   :  { %287 = vrot.lane.b32.xlu1 %v273_v40, %s4275_s25 }
 0x253   :  { %3982 = vrot.lane.b32.xlu0 %v4408_v41, %s4277_s27 }
 0x256   :  { %293 = vrot.lane.b32.xlu1 %v278_v38, %s4276_s26 }
 0x2bc   :  { %v286_v42 = vpop.permute.xlu1 %285 }
 0x2bd   :  { %v284_v43 = vpop.permute.xlu0 %283 }
 0x2be   :  { %v4414_v44 = vpack.i.bf16 %v286_v42, %v284_v43 }
 0x2c0   :  { %v290_v45 = vpop.permute.xlu1 %289  ;;  %3987 = vrot.lane.b32.xlu1 %v4414_v44, %s4277_s27 }
 0x2c1   :  { %v292_v46 = vpop.permute.xlu0 %291 }
 0x2c4   :  { %v288_v47 = vpop.permute.xlu1 %287 }
 0x2c5   :  { %v4418_v48 = vpack.i.bf16 %v290_v45, %v288_v47  ;;  %3529 = vmatprep.mubr.msk.f32.mxu1 %vm299_vm1, %v288_v47  ;;  %v3983_v49 = vpop.permute.xlu0 %3982 }
 0x2c6   :  { %v3985_v50 = vunpack.i.h.bf16 %v3983_v49  ;;  %v3984_v51 = vunpack.i.l.bf16 %v3983_v49 }
 0x2c7   :  { %3992 = vrot.lane.b32.xlu0 %v4418_v48, %s4277_s27 }
 0x2c8   :  { %v3785_v53 = vpack.c.bf16 %v3985_v50, %v3984_v51  ;;  %v294_v54 = vpop.permute.xlu1 %293 }
 0x2c9   :  { %v4429_v55 = vpack.i.bf16 %v294_v54, %v292_v46 }
 0x2ca   :  { %3787 = vmatprep.subr.msk.bf16.mxu0 %vm4425_vm2, %v3785_v53 }
 0x2cb   :  { %3997 = vrot.lane.b32.xlu1 %v4429_v55, %s4277_s27  ;;  %3790 = vmatpush3.bf16.xpose.msk.msra.mxu0 %vm4425_vm2, %v3785_v53 }
 0x2d2   :  { %3516 = vmatmul.mubr.msk.f32.vlgmr.msra.gmra.mrb[2].mxu0 %vm299_vm1, %v278_v38 }
 0x2d3   :  { %3522 = vmatprep.mubr.msk.f32.mxu0 %vm299_vm1, %v284_v43 }
 0x332   :  { %v3988_v56 = vpop.permute.xlu1 %3987 }
 0x333   :  { %v3990_v57 = vunpack.i.h.bf16 %v3988_v56  ;;  %v3989_v58 = vunpack.i.l.bf16 %v3988_v56 }
 0x335   :  { %v3791_v59 = vpack.c.bf16 %v3990_v57, %v3989_v58 }
 0x337   :  { %3793 = vmatprep.subr.msk.bf16.mxu0 %vm4425_vm2, %v3791_v59 }
 0x338   :  { %3796 = vmatpush3.bf16.xpose.msk.msra.mxu0 %vm4425_vm2, %v3791_v59 }
 0x339   :  { %v3993_v60 = vpop.permute.xlu0 %3992 }
 0x33a   :  { %v3995_v61 = vunpack.i.h.bf16 %v3993_v60  ;;  %v3994_v62 = vunpack.i.l.bf16 %v3993_v60 }
 0x33c   :  { %v3797_v63 = vpack.c.bf16 %v3995_v61, %v3994_v62 }
 0x33d   :  { %v3998_v2 = vpop.permute.xlu1 %3997 }
 0x33e   :  { %v4000_v3 = vunpack.i.h.bf16 %v3998_v2  ;;  %v3999_v4 = vunpack.i.l.bf16 %v3998_v2  ;;  %3799 = vmatprep.subr.msk.bf16.mxu1 %vm4425_vm2, %v3797_v63 }
 0x33f   :  { %3523 = vmatmul.mubr.msk.f32.vlgmr.msra.gmra.mrb[4].mxu0 %vm299_vm1, %v286_v42  ;;  %3802 = vmatpush3.bf16.xpose.msk.msra.mxu1 %vm4425_vm2, %v3797_v63 }
 0x340   :  { %v3803_v5 = vpack.c.bf16 %v4000_v3, %v3999_v4  ;;  %3536 = vmatprep.mubr.msk.f32.mxu0 %vm299_vm1, %v292_v46 }
 0x342   :  { %3805 = vmatprep.subr.msk.bf16.mxu0 %vm4425_vm2, %v3803_v5 }
 0x343   :  { %3808 = vmatpush3.bf16.xpose.msk.msra.mxu0 %vm4425_vm2, %v3803_v5 }
 0x346   :  { %3530 = vmatmul.mubr.msk.f32.vlgmr.msra.gmra.mrb[0].mxu1 %vm299_vm1, %v290_v45 }
 0x34a   :  { %3537 = vmatmul.mubr.msk.f32.vlgmr.msra.gmra.mrb[6].mxu0 %vm299_vm1, %v294_v54 }
 0x3a5   :  { %v3517_v19 = vpop.f32.mrb[2].mxu0 }
 0x3a6   :  { %v645_v22 = vmul.f32 0.35355338, %v3517_v19  ;;  %v374_v23 = vpop.f32.mrb[3].mxu0 }
 0x3a7   :  { %v644_v25 = vmul.f32 0.35355338, %v374_v23 }
 0x3a8   :  { %v653_v26 = vadd.f32 %v645_v22, %v149_v21 }
 0x3a9   :  { %v652_v27 = vadd.f32 %v644_v25, %v148_v24 }
 0x3aa   :  { %v664_v28 = vsel %vm660_vm5, %v653_v26, -inf }
 0x3ab   :  { %665 = vmax.xlane.f32.xlu1 %v664_v28  ;;  %v661_v29 = vsel %vm660_vm5, %v652_v27, -inf }
 0x3ac   :  { %662 = vmax.xlane.f32.xlu0 %v661_v29 }
 0x412   :  { %v3524_v30 = vpop.f32.mrb[4].mxu0 }
 0x413   :  { %v647_v31 = vmul.f32 0.35355338, %v3524_v30  ;;  %v461_v32 = vpop.f32.mrb[5].mxu0 }
 0x414   :  { %v646_v33 = vmul.f32 0.35355338, %v461_v32 }
 0x415   :  { %v655_v34 = vadd.f32 %v647_v31, %v149_v21 }
 0x416   :  { %v654_v36 = vadd.f32 %v646_v33, %v148_v24 }
 0x417   :  { %v670_v35 = vsel %vm660_vm5, %v655_v34, -inf }
 0x418   :  { %671 = vmax.xlane.f32.xlu0 %v670_v35  ;;  %v667_v42 = vsel %vm660_vm5, %v654_v36, -inf }
 0x419   :  { %v3531_v37 = vpop.f32.mrb[0].mxu1 }
 0x41a   :  { %v649_v38 = vmul.f32 0.35355338, %v3531_v37  ;;  %v548_v39 = vpop.f32.mrb[1].mxu1 }
 0x41b   :  { %v648_v40 = vmul.f32 0.35355338, %v548_v39 }
 0x41c   :  { %668 = vmax.xlane.f32.xlu0 %v667_v42  ;;  %v657_v43 = vadd.f32 %v649_v38, %v149_v21 }
 0x41d   :  { %v3538_v45 = vpop.f32.mrb[6].mxu0  ;;  %v656_v46 = vadd.f32 %v648_v40, %v148_v24 }
 0x41e   :  { %v651_v47 = vmul.f32 0.35355338, %v3538_v45  ;;  %v635_v49 = vpop.f32.mrb[7].mxu0  ;;  %v676_v50 = vsel %vm660_vm5, %v657_v43, -inf }
 0x41f   :  { %v650_v51 = vmul.f32 0.35355338, %v635_v49  ;;  %677 = vmax.xlane.f32.xlu1 %v676_v50  ;;  %v673_v53 = vsel %vm660_vm5, %v656_v46, -inf }
 0x420   :  { %674 = vmax.xlane.f32.xlu0 %v673_v53  ;;  %v659_v54 = vadd.f32 %v651_v47, %v149_v21 }
 0x421   :  { %v658_v56 = vadd.f32 %v650_v51, %v148_v24 }
 0x422   :  { %v682_v57 = vsel %vm660_vm5, %v659_v54, -inf }
 0x423   :  { %683 = vmax.xlane.f32.xlu1 %v682_v57  ;;  %v679_v58 = vsel %vm660_vm5, %v658_v56, -inf }
 0x424   :  { %680 = vmax.xlane.f32.xlu0 %v679_v58 }
 0x438   :  { %v666_v59 = vpop.xlane.xlu1 %665 }
 0x439   :  { %v686_v60 = vsub.f32 %v653_v26, %v666_v59  ;;  %v663_v61 = vpop.xlane.xlu0 %662 }
 0x43a   :  { %v685_v62 = vsub.f32 %v652_v27, %v663_v61 }
 0x43b   :  { %v695_v63 = vmul.f32 1.442695, %v686_v60 }
 0x43c   :  { %v693_v2 = vmul.f32 1.442695, %v685_v62 }
 0x43d   :  { %4095 = vpow2.f32 %v695_v63 }
 0x43e   :  { %4097 = vpow2.f32 %v693_v2 }
 0x447   :  { %v4480_v3 = vpop.eup %4095 }
 0x448   :  { %v4098_v4 = vpop.eup %4097  ;;  %v712_v5 = vsel %vm660_vm5, %v4480_v3, 0.0 }
 0x449   :  { %713 = vadd.xlane.f32.xlu1 %v712_v5  ;;  %v709_v6 = vsel %vm660_vm5, %v4098_v4, 0.0 }
 0x44a   :  { %710 = vadd.xlane.f32.xlu0 %v709_v6 }
 0x4a5   :  { %v672_v7 = vpop.xlane.xlu0 %671 }
 0x4a6   :  { %v688_v8 = vsub.f32 %v655_v34, %v672_v7 }
 0x4a8   :  { %v699_v10 = vmul.f32 1.442695, %v688_v8 }
 0x4a9   :  { %v669_v12 = vpop.xlane.xlu0 %668 }
 0x4aa   :  { %4099 = vpow2.f32 %v699_v10  ;;  %v687_v14 = vsub.f32 %v654_v36, %v669_v12 }
 0x4ac   :  { %v697_v17 = vmul.f32 1.442695, %v687_v14  ;;  %v678_v19 = vpop.xlane.xlu1 %677 }
 0x4ad   :  { %v690_v21 = vsub.f32 %v657_v43, %v678_v19  ;;  %v675_v22 = vpop.xlane.xlu0 %674 }
 0x4ae   :  { %4101 = vpow2.f32 %v697_v17  ;;  %v689_v23 = vsub.f32 %v656_v46, %v675_v22 }
 0x4af   :  { %v703_v24 = vmul.f32 1.442695, %v690_v21 }
 0x4b0   :  { %v701_v25 = vmul.f32 1.442695, %v689_v23  ;;  %v684_v26 = vpop.xlane.xlu1 %683 }
 0x4b1   :  { %4103 = vpow2.f32 %v703_v24  ;;  %v692_v27 = vsub.f32 %v659_v54, %v684_v26  ;;  %v681_v28 = vpop.xlane.xlu0 %680 }
 0x4b2   :  { %4105 = vpow2.f32 %v701_v25  ;;  %v691_v29 = vsub.f32 %v658_v56, %v681_v28 }
 0x4b3   :  { %v707_v30 = vmul.f32 1.442695, %v692_v27 }
 0x4b4   :  { %v4485_v31 = vpop.eup %4099  ;;  %v705_v32 = vmul.f32 1.442695, %v691_v29 }
 0x4b5   :  { %4107 = vpow2.f32 %v707_v30  ;;  %v718_v33 = vsel %vm660_vm5, %v4485_v31, 0.0  ;;  %v107_v30 = vld [vmem:[#allocation7] sm:$0xff] }
 0x4b6   :  { %4109 = vpow2.f32 %v705_v32  ;;  %719 = vadd.xlane.f32.xlu1 %v718_v33  ;;  %v108_v32 = vld [vmem:[#allocation7 + $0x8] sm:$0xff]  ;;  %v110_v33 = vld [vmem:[#allocation7 + $0x18] sm:$0xff] }
 0x4b8   :  { %v4489_v34 = vpop.eup %4101 }
 0x4b9   :  { %v715_v35 = vsel %vm660_vm5, %v4489_v34, 0.0 }
 0x4ba   :  { %716 = vadd.xlane.f32.xlu0 %v715_v35 }
 0x4bb   :  { %v4493_v36 = vpop.eup %4103 }
 0x4bc   :  { %v4106_v37 = vpop.eup %4105  ;;  %v724_v38 = vsel %vm660_vm5, %v4493_v36, 0.0 }
 0x4bd   :  { %725 = vadd.xlane.f32.xlu1 %v724_v38  ;;  %v721_v39 = vsel %vm660_vm5, %v4106_v37, 0.0 }
 0x4be   :  { %722 = vadd.xlane.f32.xlu0 %v721_v39 }
 0x4bf   :  { %v4498_v40 = vpop.eup %4107 }
 0x4c0   :  { %v4500_v42 = vpop.eup %4109  ;;  %v730_v43 = vsel %vm660_vm5, %v4498_v40, 0.0 }
 0x4c1   :  { %731 = vadd.xlane.f32.xlu1 %v730_v43  ;;  %v727_v45 = vsel %vm660_vm5, %v4500_v42, 0.0 }
 0x4c2   :  { %728 = vadd.xlane.f32.xlu0 %v727_v45 }
 0x4d2   :  { %4007 = vrot.lane.b32.xlu1 %v4414_v44, %s4279_s28 }
 0x4d6   :  { %4012 = vrot.lane.b32.xlu1 %v4418_v48, %s4279_s28  ;;  %v714_v50 = vpop.xlane.xlu1 %713 }
 0x4d7   :  { %v711_v46 = vpop.xlane.xlu0 %710 }
 0x4d8   :  { %4111 = vrcp.f32 %v711_v46  ;;  %4002 = vrot.lane.b32.xlu0 %v4408_v41, %s4279_s28 }
 0x4da   :  { %4017 = vrot.lane.b32.xlu1 %v4429_v55, %s4279_s28 }
 0x4e2   :  { %v4112_v47 = vpop.eup %4111 }
 0x4e3   :  { %v741_v49 = vmul.f32 %v4112_v47, %v4098_v4 }
 0x4e5   :  { %3543 = vmatprep.mubr.msk.f32.mxu1 %vm660_vm5, %v741_v49 }
 0x543   :  { %v720_v51 = vpop.xlane.xlu1 %719 }
 0x547   :  { %v717_v53 = vpop.xlane.xlu0 %716 }
 0x54a   :  { %v726_v54 = vpop.xlane.xlu1 %725 }
 0x54b   :  { %v723_v56 = vpop.xlane.xlu0 %722 }
 0x54c   :  { %4113 = vrcp.f32 %v723_v56 }
 0x54d   :  { %4115 = vrcp.f32 %v714_v50 }
 0x54e   :  { %4117 = vrcp.f32 %v717_v53  ;;  %v732_v44 = vpop.xlane.xlu1 %731 }
 0x54f   :  { %v729_v48 = vpop.xlane.xlu0 %728  ;;  %4119 = vrcp.f32 %v726_v54 }
 0x550   :  { %4121 = vrcp.f32 %v720_v51 }
 0x551   :  { %4123 = vrcp.f32 %v729_v48 }
 0x552   :  { %v4008_v41 = vpop.permute.xlu1 %4007  ;;  %4125 = vrcp.f32 %v732_v44 }
 0x553   :  { %v4003_v57 = vpop.permute.xlu0 %4002  ;;  %v4010_v55 = vunpack.i.h.bf16 %v4008_v41  ;;  %v4009_v58 = vunpack.i.l.bf16 %v4008_v41 }
 0x554   :  { %v4005_v59 = vunpack.i.h.bf16 %v4003_v57  ;;  %v4004_v60 = vunpack.i.l.bf16 %v4003_v57 }
 0x555   :  { %v3813_v8 = vpack.c.bf16 %v4010_v55, %v4009_v58 }
 0x556   :  { %v4114_v61 = vpop.eup %4113  ;;  %v3809_v62 = vpack.c.bf16 %v4005_v59, %v4004_v60  ;;  %v4013_v63 = vpop.permute.xlu1 %4012  ;;  %v3283_v60 = vld [vmem:[%s4921_s5 + $0x3] ss:$0 sm:$0xff] }
 0x557   :  { %v4116_v2 = vpop.eup %4115  ;;  %v4015_v4 = vunpack.i.h.bf16 %v4013_v63  ;;  %v4014_v5 = vunpack.i.l.bf16 %v4013_v63  ;;  %v745_v6 = vmul.f32 %v4114_v61, %v4106_v37 }
 0x558   :  { %v4118_v7 = vpop.eup %4117  ;;  %3810 = vmatprep.subr.bf16.mxu1 %v3809_v62  ;;  %v742_v14 = vmul.f32 %v4116_v2, %v4480_v3 }
 0x559   :  { %v3817_v10 = vpack.c.bf16 %v4015_v4, %v4014_v5  ;;  %3812 = vmatpush3.bf16.msra.mxu1 %v3809_v62  ;;  %3557 = vmatprep.mubr.msk.f32.mxu0 %vm660_vm5, %v745_v6  ;;  %v4120_v12 = vpop.eup %4119  ;;  %v743_v23 = vmul.f32 %v4118_v7, %v4489_v34 }
 0x55a   :  { %v4018_v17 = vpop.permute.xlu1 %4017  ;;  %3814 = vmatprep.subr.bf16.mxu1 %v3813_v8  ;;  %v4122_v19 = vpop.eup %4121  ;;  %v746_v25 = vmul.f32 %v4120_v12, %v4493_v36 }
 0x55b   :  { %v4020_v21 = vunpack.i.h.bf16 %v4018_v17  ;;  %v4019_v22 = vunpack.i.l.bf16 %v4018_v17  ;;  %3818 = vmatprep.subr.bf16.mxu0 %v3817_v10  ;;  %v4124_v24 = vpop.eup %4123  ;;  %v744_v3 = vmul.f32 %v4122_v19, %v4485_v31  ;;  %v109_v31 = vld [vmem:[#allocation7 + $0x10] sm:$0xff]  ;;  %v82_v19 = vld [vmem:[%s4918_s2 + $0x88] sm:$0xff] }
 0x55c   :  { %3544 = vmatmul.mubr.msk.f32.vlgmr.msra.gmra.mrb[2].mxu1 %vm660_vm5, %v742_v14  ;;  %3820 = vmatpush3.bf16.msra.mxu0 %v3817_v10  ;;  %v4126_v27 = vpop.eup %4125  ;;  %v747_v28 = vmul.f32 %v4124_v24, %v4500_v42  ;;  %v79_v14 = vld [vmem:[%s4918_s2 + $0x10] sm:$0xff] }
 0x55d   :  { %v3821_v26 = vpack.c.bf16 %v4020_v21, %v4019_v22  ;;  %3816 = vmatpush3.bf16.msra.mxu1 %v3813_v8  ;;  %3550 = vmatprep.mubr.msk.f32.mxu1 %vm660_vm5, %v743_v23  ;;  %v748_v29 = vmul.f32 %v4126_v27, %v4498_v40  ;;  %v65_v21 = vld [vmem:[#allocation2] sm:$0xff]  ;;  %v66_v23 = vld [vmem:[#allocation2 + $0x8] sm:$0xff]  ;;  %v67_v24 = vld [vmem:[#allocation2 + $0x10] sm:$0xff] }
 0x55e   :  { %3567 = vmatprep.subr.mxu0 %v107_v30 }
 0x55f   :  { %3558 = vmatmul.mubr.msk.f32.vlgmr.msra.gmra.mrb[8].mxu0 %vm660_vm5, %v746_v25  ;;  %3822 = vmatprep.subr.bf16.mxu1 %v3821_v26 }
 0x560   :  { %3551 = vmatmul.mubr.msk.f32.vlgmr.msra.gmra.mrb[4].mxu1 %vm660_vm5, %v744_v3  ;;  %3568 = vmatpush3.msra.mxu0 %v107_v30 }
 0x561   :  { %3824 = vmatpush3.bf16.msra.mxu1 %v3821_v26  ;;  %3564 = vmatprep.mubr.msk.f32.mxu1 %vm660_vm5, %v747_v28 }
 0x562   :  { %3572 = vmatprep.subr.mxu1 %v108_v32  ;;  %3577 = vmatprep.subr.mxu0 %v109_v31 }
 0x564   :  { %3565 = vmatmul.mubr.msk.f32.vlgmr.msra.gmra.mrb[6].mxu1 %vm660_vm5, %v748_v29 }
 0x565   :  { %3573 = vmatpush3.msra.mxu1 %v108_v32 }
 0x566   :  { %3582 = vmatprep.subr.mxu1 %v110_v33 }
 0x62f   :  { %v3545_v34 = vpop.f32.mrb[2].mxu1 }
 0x630   :  { %v827_v35 = vpop.f32.mrb[3].mxu1 }
 0x631   :  { %3569 = vmatprep.mubr.msk.f32.mxu0 %vm299_vm1, %v827_v35  ;;  %v75_v35 = vld [vmem:[%s4918_s2 + $0x8] sm:$0xff] }
 0x632   :  { %v3559_v36 = vpop.f32.mrb[8].mxu0  ;;  %3570 = vmatmul.mubr.msk.f32.vlgmr.msra.gmra.mrb[10].mxu0 %vm299_vm1, %v3545_v34  ;;  %v68_v34 = vld [vmem:[#allocation2 + $0x18] sm:$0xff] }
 0x633   :  { %v3552_v37 = vpop.f32.mrb[4].mxu1  ;;  %v1001_v38 = vpop.f32.mrb[9].mxu0  ;;  %3578 = vmatpush3.msra.mxu0 %v109_v31 }
 0x634   :  { %v914_v39 = vpop.f32.mrb[5].mxu1  ;;  %3579 = vmatprep.mubr.msk.f32.mxu0 %vm299_vm1, %v1001_v38  ;;  %v77_v38 = vld [vmem:[%s4918_s2 + $0x58] sm:$0xff] }
 0x635   :  { %3574 = vmatprep.mubr.msk.f32.mxu1 %vm299_vm1, %v914_v39  ;;  %v78_v39 = vld [vmem:[%s4918_s2 + $0x80] sm:$0xff] }
 0x636   :  { %3575 = vmatmul.mubr.msk.f32.vlgmr.msra.gmra.mrb[8].mxu1 %vm299_vm1, %v3552_v37  ;;  %3580 = vmatmul.mubr.msk.f32.vlgmr.msra.gmra.mrb[12].mxu0 %vm299_vm1, %v3559_v36  ;;  %v76_v36 = vld [vmem:[%s4918_s2 + $0x30] sm:$0xff] }
 0x637   :  { %v3566_v40 = vpop.f32.mrb[6].mxu1  ;;  %3583 = vmatpush3.msra.mxu1 %v110_v33  ;;  %v3825_v37 = vpack.c.bf16 %v76_v36, %v75_v35 }
 0x638   :  { %v1088_v42 = vpop.f32.mrb[7].mxu1 }
 0x639   :  { %3584 = vmatprep.mubr.msk.f32.mxu1 %vm299_vm1, %v1088_v42  ;;  %3826 = vmatprep.subr.bf16.mxu0 %v3825_v37  ;;  %v3289_v42 = vld [vmem:[%s4921_s5 + $0x7] ss:$0 sm:$0xff] }
 0x63a   :  { %3585 = vmatmul.mubr.msk.f32.vlgmr.msra.gmra.mrb[10].mxu1 %vm299_vm1, %v3566_v40  ;;  %3828 = vmatpush3.bf16.msra.mxu0 %v3825_v37  ;;  %v3829_v40 = vpack.c.bf16 %v78_v39, %v77_v38 }
 0x63b   :  { %3606 = vmatprep.mubr.msk.f32.mxu1 %vm156_vm0, %v65_v21 }
 0x63c   :  { %3830 = vmatprep.subr.bf16.mxu0 %v3829_v40 }
 0x63e   :  { %3832 = vmatpush3.bf16.msra.mxu0 %v3829_v40 }
 0x705   :  { %v3571_v43 = vpop.f32.mrb[10].mxu0 }
 0x706   :  { %v1169_v45 = vpop.f32.mrb[11].mxu0  ;;  %v1428_v49 = vsel %vm156_vm0, %v3571_v43, 0.0 }
 0x707   :  { %v1421_v54 = vsel %vm156_vm0, %v1169_v45, 0.0 }
 0x709   :  { %v3576_v46 = vpop.f32.mrb[8].mxu1  ;;  %v3581_v47 = vpop.f32.mrb[12].mxu0 }
 0x70a   :  { %v1429_v50 = vsel %vm156_vm0, %v3576_v46, 0.0  ;;  %v1250_v51 = vpop.f32.mrb[9].mxu1  ;;  %v1331_v53 = vpop.f32.mrb[13].mxu0  ;;  %v1431_v48 = vsel %vm156_vm0, %v3581_v47, 0.0 }
 0x70b   :  { %v1430_v56 = vadd.f32 %v1429_v50, %v1428_v49  ;;  %v1422_v44 = vsel %vm156_vm0, %v1250_v51, 0.0  ;;  %v1424_v55 = vsel %vm156_vm0, %v1331_v53, 0.0 }
 0x70c   :  { %v1423_v41 = vadd.f32 %v1422_v44, %v1421_v54 }
 0x70d   :  { %v1432_v57 = vadd.f32 %v1431_v48, %v1430_v56  ;;  %v3586_v58 = vpop.f32.mrb[10].mxu1 }
 0x70e   :  { %v1425_v59 = vadd.f32 %v1424_v55, %v1423_v41  ;;  %v1433_v61 = vsel %vm156_vm0, %v3586_v58, 0.0  ;;  %v1412_v62 = vpop.f32.mrb[11].mxu1  ;;  %v3285_v58 = vld [vmem:[%s4921_s5 + $0x5] ss:$0 sm:$0xff] }
 0x70f   :  { %v1434_v63 = vadd.f32 %v1433_v61, %v1432_v57  ;;  %v1426_v2 = vsel %vm156_vm0, %v1412_v62, 0.0  ;;  %v3284_v57 = vld [vmem:[%s4921_s5 + $0x4] ss:$0 sm:$0xff] }
 0x710   :  { %v1427_v4 = vadd.f32 %v1426_v2, %v1425_v59 }
 0x711   :  { %v1440_v5 = vadd.f32 %v3283_v60, %v1434_v63 }
 0x712   :  { %v1439_v6 = vadd.f32 %v3283_v60, %v1427_v4 }
 0x713   :  { %v4544_v7 = vadd.f32 %v1440_v5, %v4370_v1  ;;  %v80_v1 = vld [vmem:[%s4918_s2 + $0x38] sm:$0xff] }
 0x714   :  { %v4547_v8 = vadd.f32 %v1439_v6, %v4368_v0  ;;  %v81_v0 = vld [vmem:[%s4918_s2 + $0x60] sm:$0xff]  ;;  %v3833_v17 = vpack.c.bf16 %v80_v1, %v79_v14 }
 0x715   :  { %v1446_v10 = vsel %vm156_vm0, %v4544_v7, 0.0  ;;  %v3837_v22 = vpack.c.bf16 %v82_v19, %v81_v0 }
 0x716   :  { %1447 = vadd.xlane.f32.xlu1 %v1446_v10  ;;  %v1443_v12 = vsel %vm156_vm0, %v4547_v8, 0.0  ;;  %3834 = vmatprep.subr.bf16.mxu1 %v3833_v17 }
 0x717   :  { %1444 = vadd.xlane.f32.xlu0 %v1443_v12  ;;  %3836 = vmatpush3.bf16.msra.mxu1 %v3833_v17 }
 0x718   :  { %3838 = vmatprep.subr.bf16.mxu1 %v3837_v22 }
 0x71b   :  { %3840 = vmatpush3.bf16.msra.mxu1 %v3837_v22 }
 0x71e   :  { %3607 = vmatmul.mubr.msk.f32.vlgmr.msra.gmra.mrb[12].mxu1 %vm156_vm0, %v66_v23 }
 0x71f   :  { %3609 = vmatprep.mubr.msk.f32.mxu1 %vm156_vm0, %v67_v24 }
 0x722   :  { %3610 = vmatmul.mubr.msk.f32.gmra.mrb[14].mxu1 %vm156_vm0, %v68_v34 }
 0x7a3   :  { %v1448_v25 = vpop.xlane.xlu1 %1447 }
 0x7a4   :  { %v1450_v26 = vmul.f32 0.03125, %v1448_v25  ;;  %v1445_v3 = vpop.xlane.xlu0 %1444 }
 0x7a5   :  { %v1449_v27 = vmul.f32 0.03125, %v1445_v3 }
 0x7a6   :  { %v1452_v28 = vsub.f32 %v4544_v7, %v1450_v26 }
 0x7a7   :  { %v1451_v29 = vsub.f32 %v4547_v8, %v1449_v27 }
 0x7a8   :  { %v1454_v31 = vmul.f32 %v1452_v28, %v1452_v28 }
 0x7a9   :  { %v1453_v30 = vmul.f32 %v1451_v29, %v1451_v29 }
 0x7aa   :  { %v1458_v33 = vsel %vm156_vm0, %v1454_v31, 0.0  ;;  %v3286_v31 = vld [vmem:[%s4921_s5 + $0x6] ss:$0 sm:$0xff] }
 0x7ab   :  { %v1455_v32 = vsel %vm156_vm0, %v1453_v30, 0.0 }
 0x7ac   :  { %1456 = vadd.xlane.f32.xlu0 %v1455_v32 }
 0x7b0   :  { %1459 = vadd.xlane.f32.xlu0 %v1458_v33 }
 0x7f1   :  { %v3608_v43 = vpop.f32.mrb[12].mxu1 }
 0x7f2   :  { %v1654_v45 = vadd.f32 %v3608_v43, %v3289_v42  ;;  %v1648_v46 = vpop.f32.mrb[13].mxu1 }
 0x7f3   :  { %v1649_v47 = vadd.f32 %v3289_v42, %v1648_v46 }
 0x7f5   :  { %v4588_v49 = vpack.i.bf16 %v1654_v45, %v1649_v47  ;;  %v3841_v50 = vpack.c.bf16 %v1654_v45, %v1649_v47  ;;  %v3611_v4 = vpop.f32.mrb[14].mxu1 }
 0x7f6   :  { %v1664_v5 = vadd.f32 %v3611_v4, %v3289_v42  ;;  %v1658_v6 = vpop.f32.mrb[15].mxu1 }
 0x7f7   :  { %4022 = vrot.lane.b32.xlu0 %v4588_v49, %s4274_s23  ;;  %3843 = vmatprep.subr.msk.bf16.mxu0 %vm4425_vm2, %v3841_v50  ;;  %v1659_v10 = vadd.f32 %v3289_v42, %v1658_v6 }
 0x7f9   :  { %v4604_v12 = vpack.i.bf16 %v1664_v5, %v1659_v10  ;;  %v3847_v14 = vpack.c.bf16 %v1664_v5, %v1659_v10 }
 0x7fb   :  { %4027 = vrot.lane.b32.xlu1 %v4604_v12, %s4274_s23 }
 0x7ff   :  { %4032 = vrot.lane.b32.xlu1 %v4588_v49, %s4275_s25 }
 0x803   :  { %4037 = vrot.lane.b32.xlu1 %v4588_v49, %s4276_s26 }
 0x839   :  { %v1457_v51 = vpop.xlane.xlu0 %1456 }
 0x83a   :  { %v1461_v53 = vmul.f32 0.03125, %v1457_v51 }
 0x83c   :  { %v1463_v54 = vadd.f32 1e-05, %v1461_v53 }
 0x83d   :  { %v1460_v56 = vpop.xlane.xlu0 %1459 }
 0x83e   :  { %4127 = vrsqrt.f32 %v1463_v54  ;;  %v1462_v44 = vmul.f32 0.03125, %v1460_v56 }
 0x840   :  { %v1464_v48 = vadd.f32 1e-05, %v1462_v44  ;;  %v150_v44 = vmul.f32 0.0625, %v139_v11 }
 0x842   :  { %4129 = vrsqrt.f32 %v1464_v48  ;;  %v151_v48 = vfloor.f32 %v150_v44 }
 0x844   :  { %vm153_vm6 = vcmp.eq.f32.partialorder %v143_v16, %v151_v48  ;;  %vm152_vm7 = vcmp.eq.f32.partialorder %v142_v18, %v151_v48 }
 0x848   :  { %v4128_v41 = vpop.eup %4127 }
 0x849   :  { %v1467_v55 = vmul.f32 %v4128_v41, %v1451_v29  ;;  %v155_v41 = vsel %vm153_vm6, 0.0, %v4278_v20 }
 0x84b   :  { %v1473_v59 = vmul.f32 %v3284_v57, %v1467_v55 }
 0x84c   :  { %v4130_v60 = vpop.eup %4129 }
 0x84d   :  { %v1468_v61 = vmul.f32 %v4130_v60, %v1452_v28  ;;  %v1479_v62 = vadd.f32 %v3285_v58, %v1473_v59 }
 0x84f   :  { %v1474_v63 = vmul.f32 %v3284_v57, %v1468_v61  ;;  %3595 = vmatprep.mubr.msk.f32.mxu0 %vm156_vm0, %v1479_v62 }
 0x851   :  { %v1480_v2 = vadd.f32 %v3285_v58, %v1474_v63  ;;  %v154_v58 = vsel %vm152_vm7, 0.0, %v4278_v20 }
 0x853   :  { %3596 = vmatmul.mubr.msk.f32.vlgmr.msra.gmra.mrb[14].mxu0 %vm156_vm0, %v1480_v2 }
 0x854   :  { %3846 = vmatpush3.bf16.xpose.msk.msra.mxu0 %vm4425_vm2, %v3841_v50 }
 0x855   :  { %3849 = vmatprep.subr.msk.bf16.mxu0 %vm4425_vm2, %v3847_v14 }
 0x85c   :  { %3852 = vmatpush3.bf16.xpose.msk.msra.mxu0 %vm4425_vm2, %v3847_v14 }
 0x869   :  { %v4616_v1 = vpop.permute.xlu0 %4022 }
 0x86a   :  { %v4025_v0 = vunpack.i.h.bf16 %v4616_v1  ;;  %v4024_v17 = vunpack.i.l.bf16 %v4616_v1 }
 0x86c   :  { %v3853_v19 = vpack.c.bf16 %v4025_v0, %v4024_v17 }
 0x86d   :  { %v4624_v21 = vpop.permute.xlu1 %4027 }
 0x86e   :  { %3855 = vmatprep.subr.msk.bf16.mxu1 %vm4425_vm2, %v3853_v19  ;;  %v4030_v22 = vunpack.i.h.bf16 %v4624_v21  ;;  %v4029_v23 = vunpack.i.l.bf16 %v4624_v21 }
 0x86f   :  { %3858 = vmatpush3.bf16.xpose.msk.msra.mxu1 %vm4425_vm2, %v3853_v19 }
 0x870   :  { %v3859_v24 = vpack.c.bf16 %v4030_v22, %v4029_v23 }
 0x871   :  { %v4628_v25 = vpop.permute.xlu1 %4032 }
 0x872   :  { %v4035_v26 = vunpack.i.h.bf16 %v4628_v25  ;;  %v4034_v3 = vunpack.i.l.bf16 %v4628_v25  ;;  %3861 = vmatprep.subr.msk.bf16.mxu1 %vm4425_vm2, %v3859_v24 }
 0x874   :  { %v3865_v27 = vpack.c.bf16 %v4035_v26, %v4034_v3 }
 0x875   :  { %v4636_v28 = vpop.permute.xlu1 %4037 }
 0x876   :  { %v4040_v29 = vunpack.i.h.bf16 %v4636_v28  ;;  %v4039_v30 = vunpack.i.l.bf16 %v4636_v28  ;;  %3867 = vmatprep.subr.msk.bf16.mxu0 %vm4425_vm2, %v3865_v27 }
 0x877   :  { %3864 = vmatpush3.bf16.xpose.msk.msra.mxu1 %vm4425_vm2, %v3859_v24 }
 0x878   :  { %v3877_v32 = vpack.c.bf16 %v4040_v29, %v4039_v30 }
 0x87a   :  { %3879 = vmatprep.subr.msk.bf16.mxu1 %vm4425_vm2, %v3877_v32 }
 0x926   :  { %v3597_v33 = vpop.f32.mrb[14].mxu0 }
 0x927   :  { %v1563_v34 = vadd.f32 %v3597_v33, %v3286_v31  ;;  %v1557_v35 = vpop.f32.mrb[15].mxu0 }
 0x928   :  { %v1558_v36 = vadd.f32 %v3286_v31, %v1557_v35 }
 0x929   :  { %1671 = vrot.lane.b32.xlu1 %v1563_v34, %s4274_s23 }
 0x92a   :  { %3620 = vmatprep.mubr.msk.f32.mxu0 %vm299_vm1, %v1558_v36  ;;  %1669 = vrot.lane.b32.xlu0 %v1558_v36, %s4274_s23 }
 0x92b   :  { %3621 = vmatmul.mubr.msk.f32.vlgmr.msra.gmra.mrb[16].mxu0 %vm299_vm1, %v1563_v34 }
 0x92c   :  { %3870 = vmatpush3.bf16.xpose.msk.msra.mxu0 %vm4425_vm2, %v3865_v27 }
 0x92d   :  { %4047 = vrot.lane.b32.xlu1 %v4604_v12, %s4276_s26 }
 0x92e   :  { %4042 = vrot.lane.b32.xlu0 %v4604_v12, %s4275_s25 }
 0x931   :  { %1675 = vrot.lane.b32.xlu1 %v1563_v34, %s4275_s25 }
 0x932   :  { %1673 = vrot.lane.b32.xlu0 %v1558_v36, %s4275_s25 }
 0x935   :  { %1679 = vrot.lane.b32.xlu1 %v1563_v34, %s4276_s26 }
 0x936   :  { %1677 = vrot.lane.b32.xlu0 %v1558_v36, %s4276_s26 }
 0x99b   :  { %v1672_v37 = vpop.permute.xlu1 %1671 }
 0x99c   :  { %v1670_v38 = vpop.permute.xlu0 %1669 }
 0x99d   :  { %3631 = vmatprep.mubr.msk.f32.mxu1 %vm299_vm1, %v1670_v38 }
 0x99e   :  { %3632 = vmatmul.mubr.msk.f32.vlgmr.msra.gmra.mrb[16].mxu1 %vm299_vm1, %v1672_v37 }
 0x99f   :  { %3882 = vmatpush3.bf16.xpose.msk.msra.mxu1 %vm4425_vm2, %v3877_v32  ;;  %v4665_v39 = vpop.permute.xlu1 %4047 }
 0x9a0   :  { %v4050_v40 = vunpack.i.h.bf16 %v4665_v39  ;;  %v4049_v42 = vunpack.i.l.bf16 %v4665_v39  ;;  %v4669_v43 = vpop.permute.xlu0 %4042 }
 0x9a1   :  { %v4045_v45 = vunpack.i.h.bf16 %v4669_v43  ;;  %v4044_v46 = vunpack.i.l.bf16 %v4669_v43 }
 0x9a2   :  { %v3883_v47 = vpack.c.bf16 %v4050_v40, %v4049_v42 }
 0x9a3   :  { %v3871_v50 = vpack.c.bf16 %v4045_v45, %v4044_v46  ;;  %v1676_v53 = vpop.permute.xlu1 %1675 }
 0x9a4   :  { %v1674_v51 = vpop.permute.xlu0 %1673  ;;  %3885 = vmatprep.subr.msk.bf16.mxu1 %vm4425_vm2, %v3883_v47 }
 0x9a5   :  { %3873 = vmatprep.subr.msk.bf16.mxu0 %vm4425_vm2, %v3871_v50  ;;  %3642 = vmatprep.mubr.msk.f32.mxu0 %vm299_vm1, %v1674_v51 }
 0x9a6   :  { %3876 = vmatpush3.bf16.xpose.msk.msra.mxu0 %vm4425_vm2, %v3871_v50 }
 0x9a7   :  { %3888 = vmatpush3.bf16.xpose.msk.msra.mxu1 %vm4425_vm2, %v3883_v47  ;;  %v1680_v56 = vpop.permute.xlu1 %1679 }
 0x9a8   :  { %v1678_v54 = vpop.permute.xlu0 %1677 }
 0x9a9   :  { %3653 = vmatprep.mubr.msk.f32.mxu1 %vm299_vm1, %v1678_v54 }
 0x9ad   :  { %3643 = vmatmul.mubr.msk.f32.vlgmr.msra.gmra.mrb[18].mxu0 %vm299_vm1, %v1676_v53 }
 0x9ae   :  { %3654 = vmatmul.mubr.msk.f32.vlgmr.msra.gmra.mrb[18].mxu1 %vm299_vm1, %v1680_v56 }
 0x9fe   :  { %v3622_v52 = vpop.f32.mrb[16].mxu0 }
 0x9ff   :  { %v2058_v57 = vmul.f32 0.35355338, %v3622_v52  ;;  %v1787_v55 = vpop.f32.mrb[17].mxu0 }
 0xa00   :  { %v2057_v59 = vmul.f32 0.35355338, %v1787_v55 }
 0xa01   :  { %v2066_v60 = vadd.f32 %v2058_v57, %v155_v41 }
 0xa02   :  { %v2065_v61 = vadd.f32 %v2057_v59, %v154_v58 }
 0xa03   :  { %v2076_v9 = vsel %vm156_vm0, %v2066_v60, -inf }
 0xa04   :  { %2077 = vmax.xlane.f32.xlu1 %v2076_v9  ;;  %v2073_v11 = vsel %vm156_vm0, %v2065_v61, -inf }
 0xa05   :  { %2074 = vmax.xlane.f32.xlu0 %v2073_v11 }
 0xa71   :  { %v3633_v13 = vpop.f32.mrb[16].mxu1 }
 0xa72   :  { %v2060_v16 = vmul.f32 0.35355338, %v3633_v13  ;;  %v1874_v15 = vpop.f32.mrb[17].mxu1 }
 0xa73   :  { %v2059_v18 = vmul.f32 0.35355338, %v1874_v15 }
 0xa74   :  { %v2068_v62 = vadd.f32 %v2060_v16, %v155_v41 }
 0xa75   :  { %v2067_v2 = vadd.f32 %v2059_v18, %v154_v58 }
 0xa76   :  { %v2082_v63 = vsel %vm156_vm0, %v2068_v62, -inf }
 0xa77   :  { %2083 = vmax.xlane.f32.xlu0 %v2082_v63  ;;  %v2079_v20 = vsel %vm156_vm0, %v2067_v2, -inf }
 0xa7b   :  { %2080 = vmax.xlane.f32.xlu0 %v2079_v20 }
 0xa80   :  { %v3644_v4 = vpop.f32.mrb[18].mxu0 }
 0xa81   :  { %v2062_v5 = vmul.f32 0.35355338, %v3644_v4  ;;  %v3655_v6 = vpop.f32.mrb[18].mxu1  ;;  %v1961_v10 = vpop.f32.mrb[19].mxu0 }
 0xa82   :  { %v2064_v14 = vmul.f32 0.35355338, %v3655_v6  ;;  %v2061_v0 = vmul.f32 0.35355338, %v1961_v10  ;;  %v2048_v17 = vpop.f32.mrb[19].mxu1 }
 0xa83   :  { %v2063_v19 = vmul.f32 0.35355338, %v2048_v17  ;;  %v2070_v22 = vadd.f32 %v2062_v5, %v155_v41 }
 0xa84   :  { %v2069_v23 = vadd.f32 %v2061_v0, %v154_v58  ;;  %v2072_v26 = vadd.f32 %v2064_v14, %v155_v41 }
 0xa85   :  { %v2088_v24 = vsel %vm156_vm0, %v2070_v22, -inf  ;;  %v2071_v27 = vadd.f32 %v2063_v19, %v154_v58 }
 0xa86   :  { %2089 = vmax.xlane.f32.xlu1 %v2088_v24  ;;  %v2085_v3 = vsel %vm156_vm0, %v2069_v23, -inf  ;;  %v2094_v29 = vsel %vm156_vm0, %v2072_v26, -inf }
 0xa87   :  { %2086 = vmax.xlane.f32.xlu0 %v2085_v3  ;;  %v2091_v30 = vsel %vm156_vm0, %v2071_v27, -inf }
 0xa8a   :  { %2095 = vmax.xlane.f32.xlu1 %v2094_v29 }
 0xa8b   :  { %2092 = vmax.xlane.f32.xlu0 %v2091_v30 }
 0xa91   :  { %v2078_v33 = vpop.xlane.xlu1 %2077 }
 0xa92   :  { %v2075_v32 = vpop.xlane.xlu0 %2074 }
 0xa93   :  { %v2097_v31 = vsub.f32 %v2065_v61, %v2075_v32 }
 0xa95   :  { %v2105_v34 = vmul.f32 1.442695, %v2097_v31 }
 0xa97   :  { %4131 = vpow2.f32 %v2105_v34 }
 0xa9b   :  { %4057 = vrot.lane.b32.xlu1 %v4616_v1, %s4277_s27  ;;  %v2098_v1 = vsub.f32 %v2066_v60, %v2078_v33 }
 0xa9d   :  { %v2107_v35 = vmul.f32 1.442695, %v2098_v1 }
 0xa9f   :  { %4062 = vrot.lane.b32.xlu1 %v4604_v12, %s4277_s27  ;;  %4133 = vpow2.f32 %v2107_v35 }
 0xaa1   :  { %4052 = vrot.lane.b32.xlu0 %v4588_v49, %s4277_s27  ;;  %v4713_v12 = vpop.eup %4131 }
 0xaa2   :  { %v2121_v49 = vsel %vm156_vm0, %v4713_v12, 0.0 }
 0xaa3   :  { %4067 = vrot.lane.b32.xlu1 %v4624_v21, %s4277_s27 }
 0xaa5   :  { %4072 = vrot.lane.b32.xlu0 %v4628_v25, %s4277_s27 }
 0xaa7   :  { %4077 = vrot.lane.b32.xlu1 %v4636_v28, %s4277_s27 }
 0xaa9   :  { %v4717_v21 = vpop.eup %4133 }
 0xaaa   :  { %v2124_v25 = vsel %vm156_vm0, %v4717_v21, 0.0 }
 0xac4   :  { %2122 = vadd.xlane.f32.xlu0 %v2121_v49 }
 0xacb   :  { %2125 = vadd.xlane.f32.xlu1 %v2124_v25 }
 0xb04   :  { %v2084_v28 = vpop.xlane.xlu0 %2083 }
 0xb05   :  { %v2100_v36 = vsub.f32 %v2068_v62, %v2084_v28 }
 0xb07   :  { %v2111_v37 = vmul.f32 1.442695, %v2100_v36 }
 0xb08   :  { %v2081_v38 = vpop.xlane.xlu0 %2080 }
 0xb09   :  { %4135 = vpow2.f32 %v2111_v37  ;;  %v2099_v40 = vsub.f32 %v2067_v2, %v2081_v38 }
 0xb0b   :  { %v2109_v42 = vmul.f32 1.442695, %v2099_v40 }
 0xb0d   :  { %4137 = vpow2.f32 %v2109_v42 }
 0xb13   :  { %v4721_v45 = vpop.eup %4135  ;;  %v2090_v46 = vpop.xlane.xlu1 %2089 }
 0xb14   :  { %v2102_v47 = vsub.f32 %v2070_v22, %v2090_v46  ;;  %v2087_v50 = vpop.xlane.xlu0 %2086  ;;  %v2130_v51 = vsel %vm156_vm0, %v4721_v45, 0.0 }
 0xb15   :  { %v2101_v53 = vsub.f32 %v2069_v23, %v2087_v50  ;;  %2131 = vadd.xlane.f32.xlu1 %v2130_v51 }
 0xb16   :  { %v2115_v54 = vmul.f32 1.442695, %v2102_v47 }
 0xb17   :  { %v4725_v56 = vpop.eup %4137  ;;  %v2113_v44 = vmul.f32 1.442695, %v2101_v53  ;;  %v2096_v48 = vpop.xlane.xlu1 %2095 }
 0xb18   :  { %4139 = vpow2.f32 %v2115_v54  ;;  %v2104_v52 = vsub.f32 %v2072_v26, %v2096_v48  ;;  %v2093_v41 = vpop.xlane.xlu0 %2092  ;;  %v2127_v57 = vsel %vm156_vm0, %v4725_v56, 0.0 }
 0xb19   :  { %4141 = vpow2.f32 %v2113_v44  ;;  %v2103_v55 = vsub.f32 %v2071_v27, %v2093_v41  ;;  %2128 = vadd.xlane.f32.xlu0 %v2127_v57 }
 0xb1a   :  { %v2119_v58 = vmul.f32 1.442695, %v2104_v52 }
 0xb1b   :  { %v2117_v59 = vmul.f32 1.442695, %v2103_v55  ;;  %v4058_v60 = vpop.permute.xlu1 %4057  ;;  %v112_v55 = vld [vmem:[#allocation7 + $0x20] sm:$0xff] }
 0xb1c   :  { %4143 = vpow2.f32 %v2119_v58  ;;  %v4060_v61 = vunpack.i.h.bf16 %v4058_v60  ;;  %v4059_v9 = vunpack.i.l.bf16 %v4058_v60  ;;  %v4053_v11 = vpop.permute.xlu0 %4052 }
 0xb1d   :  { %4145 = vpow2.f32 %v2117_v59  ;;  %v4055_v13 = vunpack.i.h.bf16 %v4053_v11  ;;  %v4054_v16 = vunpack.i.l.bf16 %v4053_v11  ;;  %v113_v11 = vld [vmem:[#allocation7 + $0x28] sm:$0xff] }
 0xb1e   :  { %v3897_v15 = vpack.c.bf16 %v4060_v61, %v4059_v9 }
 0xb1f   :  { %v3889_v18 = vpack.c.bf16 %v4055_v13, %v4054_v16  ;;  %v4063_v62 = vpop.permute.xlu1 %4062  ;;  %v114_v13 = vld [vmem:[#allocation7 + $0x30] sm:$0xff]  ;;  %v115_v16 = vld [vmem:[#allocation7 + $0x38] sm:$0xff] }
 0xb20   :  { %v4065_v63 = vunpack.i.h.bf16 %v4063_v62  ;;  %v4064_v2 = vunpack.i.l.bf16 %v4063_v62  ;;  %3898 = vmatprep.subr.bf16.mxu1 %v3897_v15  ;;  %v4073_v20 = vpop.permute.xlu0 %4072 }
 0xb21   :  { %v4075_v4 = vunpack.i.h.bf16 %v4073_v20  ;;  %v4074_v5 = vunpack.i.l.bf16 %v4073_v20  ;;  %3890 = vmatprep.subr.bf16.mxu0 %v3889_v18  ;;  %3900 = vmatpush3.bf16.msra.mxu1 %v3897_v15 }
 0xb22   :  { %v4729_v6 = vpop.eup %4139  ;;  %v3893_v10 = vpack.c.bf16 %v4065_v63, %v4064_v2  ;;  %3892 = vmatpush3.bf16.msra.mxu0 %v3889_v18 }
 0xb23   :  { %v4731_v14 = vpop.eup %4141  ;;  %v4068_v0 = vpop.permute.xlu1 %4067  ;;  %v2136_v17 = vsel %vm156_vm0, %v4729_v6, 0.0  ;;  %v3905_v24 = vpack.c.bf16 %v4075_v4, %v4074_v5 }
 0xb24   :  { %v4070_v19 = vunpack.i.h.bf16 %v4068_v0  ;;  %v4069_v22 = vunpack.i.l.bf16 %v4068_v0  ;;  %2137 = vadd.xlane.f32.xlu1 %v2136_v17  ;;  %3894 = vmatprep.subr.bf16.mxu0 %v3893_v10  ;;  %v2133_v23 = vsel %vm156_vm0, %v4731_v14, 0.0 }
 0xb25   :  { %2134 = vadd.xlane.f32.xlu0 %v2133_v23 }
 0xb26   :  { %v4737_v26 = vpop.eup %4143  ;;  %v3901_v3 = vpack.c.bf16 %v4070_v19, %v4069_v22  ;;  %3896 = vmatpush3.bf16.msra.mxu0 %v3893_v10 }
 0xb27   :  { %v4739_v27 = vpop.eup %4145  ;;  %v4078_v29 = vpop.permute.xlu1 %4077  ;;  %3906 = vmatprep.subr.bf16.mxu0 %v3905_v24  ;;  %v2142_v30 = vsel %vm156_vm0, %v4737_v26, 0.0 }
 0xb28   :  { %v4080_v32 = vunpack.i.h.bf16 %v4078_v29  ;;  %v4079_v31 = vunpack.i.l.bf16 %v4078_v29  ;;  %2143 = vadd.xlane.f32.xlu1 %v2142_v30  ;;  %3902 = vmatprep.subr.bf16.mxu1 %v3901_v3  ;;  %v2139_v33 = vsel %vm156_vm0, %v4739_v27, 0.0 }
 0xb29   :  { %3904 = vmatpush3.bf16.msra.mxu1 %v3901_v3  ;;  %2140 = vadd.xlane.f32.xlu0 %v2139_v33 }
 0xb2a   :  { %v3913_v34 = vpack.c.bf16 %v4080_v32, %v4079_v31 }
 0xb2c   :  { %3914 = vmatprep.subr.bf16.mxu1 %v3913_v34 }
 0xb39   :  { %4087 = vrot.lane.b32.xlu1 %v4665_v39, %s4277_s27 }
 0xb3f   :  { %4082 = vrot.lane.b32.xlu0 %v4669_v43, %s4277_s27 }
 0xb51   :  { %v2123_v1 = vpop.xlane.xlu0 %2122 }
 0xb52   :  { %4147 = vrcp.f32 %v2123_v1 }
 0xb58   :  { %v2126_v35 = vpop.xlane.xlu1 %2125 }
 0xb59   :  { %4149 = vrcp.f32 %v2126_v35 }
 0xb5c   :  { %v4148_v49 = vpop.eup %4147 }
 0xb5d   :  { %v2153_v25 = vmul.f32 %v4148_v49, %v4713_v12 }
 0xb5f   :  { %3664 = vmatprep.mubr.msk.f32.mxu0 %vm156_vm0, %v2153_v25 }
 0xb63   :  { %v4150_v28 = vpop.eup %4149 }
 0xb64   :  { %v2154_v36 = vmul.f32 %v4150_v28, %v4717_v21 }
 0xb66   :  { %3665 = vmatmul.mubr.msk.f32.vlgmr.msra.gmra.mrb[20].mxu0 %vm156_vm0, %v2154_v36 }
 0xb67   :  { %3908 = vmatpush3.bf16.msra.mxu0 %v3905_v24 }
 0xba2   :  { %v2132_v37 = vpop.xlane.xlu1 %2131 }
 0xba3   :  { %4151 = vrcp.f32 %v2132_v37 }
 0xba6   :  { %v2129_v39 = vpop.xlane.xlu0 %2128 }
 0xba7   :  { %4153 = vrcp.f32 %v2129_v39 }
 0xbad   :  { %v4152_v43 = vpop.eup %4151 }
 0xbae   :  { %v2156_v12 = vmul.f32 %v4152_v43, %v4721_v45 }
 0xbb1   :  { %v4154_v38 = vpop.eup %4153  ;;  %v2138_v40 = vpop.xlane.xlu1 %2137 }
 0xbb2   :  { %v2135_v42 = vpop.xlane.xlu0 %2134  ;;  %v2155_v46 = vmul.f32 %v4154_v38, %v4725_v56 }
 0xbb3   :  { %4155 = vrcp.f32 %v2135_v42 }
 0xbb4   :  { %4157 = vrcp.f32 %v2138_v40  ;;  %3675 = vmatprep.mubr.msk.f32.mxu1 %vm156_vm0, %v2155_v46 }
 0xbb5   :  { %v2144_v21 = vpop.xlane.xlu1 %2143  ;;  %3676 = vmatmul.mubr.msk.f32.vlgmr.msra.gmra.mrb[20].mxu1 %vm156_vm0, %v2156_v12 }
 0xbb6   :  { %4159 = vrcp.f32 %v2144_v21  ;;  %3916 = vmatpush3.bf16.msra.mxu1 %v3913_v34  ;;  %v2141_v47 = vpop.xlane.xlu0 %2140  ;;  %v3334_v34 = vld [vmem:[%s4921_s5 + $0x8] ss:$0 sm:$0xff] }
 0xbb7   :  { %4161 = vrcp.f32 %v2141_v47 }
 0xbb9   :  { %v4088_v50 = vpop.permute.xlu1 %4087 }
 0xbba   :  { %v4090_v51 = vunpack.i.h.bf16 %v4088_v50  ;;  %v4089_v53 = vunpack.i.l.bf16 %v4088_v50  ;;  %v4083_v54 = vpop.permute.xlu0 %4082 }
 0xbbb   :  { %v4085_v44 = vunpack.i.h.bf16 %v4083_v54  ;;  %v4084_v48 = vunpack.i.l.bf16 %v4083_v54  ;;  %v83_v54 = vld [vmem:[%s4918_s2 + $0x18] sm:$0xff] }
 0xbbc   :  { %v3917_v56 = vpack.c.bf16 %v4090_v51, %v4089_v53 }
 0xbbd   :  { %v4156_v52 = vpop.eup %4155  ;;  %v3909_v45 = vpack.c.bf16 %v4085_v44, %v4084_v48  ;;  %v84_v44 = vld [vmem:[%s4918_s2 + $0x40] sm:$0xff] }
 0xbbe   :  { %v4158_v41 = vpop.eup %4157  ;;  %3918 = vmatprep.subr.bf16.mxu1 %v3917_v56  ;;  %v2157_v57 = vmul.f32 %v4156_v52, %v4731_v14  ;;  %v3921_v48 = vpack.c.bf16 %v84_v44, %v83_v54  ;;  %v86_v52 = vld [vmem:[%s4918_s2 + $0x90] sm:$0xff] }
 0xbbf   :  { %3910 = vmatprep.subr.bf16.mxu0 %v3909_v45  ;;  %3920 = vmatpush3.bf16.msra.mxu1 %v3917_v56  ;;  %v2158_v60 = vmul.f32 %v4158_v41, %v4729_v6  ;;  %v85_v56 = vld [vmem:[%s4918_s2 + $0x68] sm:$0xff] }
 0xbc0   :  { %v4160_v58 = vpop.eup %4159  ;;  %3912 = vmatpush3.bf16.msra.mxu0 %v3909_v45  ;;  %3686 = vmatprep.mubr.msk.f32.mxu0 %vm156_vm0, %v2157_v57  ;;  %v3925_v45 = vpack.c.bf16 %v86_v52, %v85_v56 }
 0xbc1   :  { %v4162_v59 = vpop.eup %4161  ;;  %3700 = vmatprep.subr.mxu0 %v112_v55  ;;  %v2160_v9 = vmul.f32 %v4160_v58, %v4737_v26  ;;  %3705 = vmatprep.subr.mxu1 %v113_v11 }
 0xbc2   :  { %v2159_v61 = vmul.f32 %v4162_v59, %v4739_v27 }
 0xbc3   :  { %3687 = vmatmul.mubr.msk.f32.vlgmr.msra.gmra.mrb[22].mxu0 %vm156_vm0, %v2158_v60 }
 0xbc4   :  { %3697 = vmatprep.mubr.msk.f32.mxu1 %vm156_vm0, %v2159_v61  ;;  %3701 = vmatpush3.msra.mxu0 %v112_v55 }
 0xbc5   :  { %3698 = vmatmul.mubr.msk.f32.vlgmr.msra.gmra.mrb[22].mxu1 %vm156_vm0, %v2160_v9  ;;  %3710 = vmatprep.subr.mxu0 %v114_v13  ;;  %v3335_v9 = vld [vmem:[%s4921_s5 + $0x9] ss:$0 sm:$0xff] }
 0xbc6   :  { %3706 = vmatpush3.msra.mxu1 %v113_v11 }
 0xbc7   :  { %3715 = vmatprep.subr.mxu1 %v115_v16 }
 0xc39   :  { %v3666_v15 = vpop.f32.mrb[20].mxu0 }
 0xc3a   :  { %v2245_v18 = vpop.f32.mrb[21].mxu0 }
 0xc3b   :  { %3702 = vmatprep.mubr.msk.f32.mxu0 %vm299_vm1, %v2245_v18 }
 0xc3c   :  { %3703 = vmatmul.mubr.msk.f32.vlgmr.msra.gmra.mrb[24].mxu0 %vm299_vm1, %v3666_v15 }
 0xc3d   :  { %3711 = vmatpush3.msra.mxu0 %v114_v13  ;;  %v3336_v13 = vld [vmem:[%s4921_s5 + $0xa] ss:$0 sm:$0xff] }
 0xc3e   :  { %3922 = vmatprep.subr.bf16.mxu0 %v3921_v48 }
 0xc88   :  { %v3677_v62 = vpop.f32.mrb[20].mxu1 }
 0xc89   :  { %v2338_v63 = vpop.f32.mrb[21].mxu1 }
 0xc8a   :  { %3707 = vmatprep.mubr.msk.f32.mxu1 %vm299_vm1, %v2338_v63 }
 0xc8b   :  { %3708 = vmatmul.mubr.msk.f32.vlgmr.msra.gmra.mrb[24].mxu1 %vm299_vm1, %v3677_v62 }
 0xc8c   :  { %3716 = vmatpush3.msra.mxu1 %v115_v16 }
 0xc96   :  { %v3688_v2 = vpop.f32.mrb[22].mxu0 }
 0xc97   :  { %v2431_v20 = vpop.f32.mrb[23].mxu0 }
 0xc98   :  { %v3699_v4 = vpop.f32.mrb[22].mxu1  ;;  %3712 = vmatprep.mubr.msk.f32.mxu0 %vm299_vm1, %v2431_v20  ;;  %v91_v20 = vld [vmem:[%s4919_s3] sm:$0xff] }
 0xc99   :  { %v2524_v5 = vpop.f32.mrb[23].mxu1  ;;  %3713 = vmatmul.mubr.msk.f32.vlgmr.msra.gmra.mrb[26].mxu0 %vm299_vm1, %v3688_v2 }
 0xc9a   :  { %3717 = vmatprep.mubr.msk.f32.mxu1 %vm299_vm1, %v2524_v5  ;;  %3924 = vmatpush3.bf16.msra.mxu0 %v3921_v48 }
 0xc9b   :  { %3718 = vmatmul.mubr.msk.f32.vlgmr.msra.gmra.mrb[26].mxu1 %vm299_vm1, %v3699_v4  ;;  %3926 = vmatprep.subr.bf16.mxu0 %v3925_v45  ;;  %v92_v4 = vld [vmem:[%s4919_s3 + $0x8] sm:$0xff] }
 0xc9c   :  { %v3929_v5 = vpack.c.bf16 %v92_v4, %v91_v20 }
 0xc9e   :  { %3928 = vmatpush3.bf16.msra.mxu0 %v3925_v45  ;;  %3930 = vmatprep.subr.bf16.mxu1 %v3929_v5 }
 0xc9f   :  { %3932 = vmatpush3.bf16.msra.mxu1 %v3929_v5  ;;  %v87_v5 = vld [vmem:[%s4918_s2 + $0x20] sm:$0xff] }
 0xd0f   :  { %v3704_v6 = vpop.f32.mrb[24].mxu0 }
 0xd10   :  { %v2605_v10 = vpop.f32.mrb[25].mxu0  ;;  %v2864_v0 = vsel %vm156_vm0, %v3704_v6, 0.0  ;;  %v93_v6 = vld [vmem:[%s4919_s3 + $0x10] sm:$0xff] }
 0xd11   :  { %v2857_v22 = vsel %vm156_vm0, %v2605_v10, 0.0  ;;  %v94_v10 = vld [vmem:[%s4919_s3 + $0x18] sm:$0xff] }
 0xd5e   :  { %v3709_v14 = vpop.f32.mrb[24].mxu1 }
 0xd5f   :  { %v2865_v17 = vsel %vm156_vm0, %v3709_v14, 0.0  ;;  %v2686_v19 = vpop.f32.mrb[25].mxu1  ;;  %v3933_v14 = vpack.c.bf16 %v94_v10, %v93_v6  ;;  %v88_v6 = vld [vmem:[%s4918_s2 + $0x48] sm:$0xff] }
 0xd60   :  { %v2866_v23 = vadd.f32 %v2865_v17, %v2864_v0  ;;  %v2858_v24 = vsel %vm156_vm0, %v2686_v19, 0.0  ;;  %v95_v0 = vld [vmem:[%s4919_s3 + $0x20] sm:$0xff]  ;;  %v96_v17 = vld [vmem:[%s4919_s3 + $0x28] sm:$0xff]  ;;  %v3961_v10 = vpack.c.bf16 %v88_v6, %v87_v5 }
 0xd61   :  { %v2859_v26 = vadd.f32 %v2858_v24, %v2857_v22  ;;  %3934 = vmatprep.subr.bf16.mxu1 %v3933_v14  ;;  %v3937_v19 = vpack.c.bf16 %v96_v17, %v95_v0  ;;  %v97_v22 = vld [vmem:[%s4919_s3 + $0x30] sm:$0xff]  ;;  %v90_v0 = vld [vmem:[%s4918_s2 + $0x98] sm:$0xff] }
 0xd62   :  { %3936 = vmatpush3.bf16.msra.mxu1 %v3933_v14  ;;  %v89_v14 = vld [vmem:[%s4918_s2 + $0x70] sm:$0xff]  ;;  %3962 = vmatprep.subr.bf16.mxu0 %v3961_v10 }
 0xd63   :  { %3938 = vmatprep.subr.bf16.mxu1 %v3937_v19  ;;  %v3965_v17 = vpack.c.bf16 %v90_v0, %v89_v14 }
 0xd66   :  { %3940 = vmatpush3.bf16.msra.mxu1 %v3937_v19 }
 0xd6c   :  { %v3714_v3 = vpop.f32.mrb[26].mxu0 }
 0xd6d   :  { %v2867_v27 = vsel %vm156_vm0, %v3714_v3, 0.0  ;;  %v2767_v29 = vpop.f32.mrb[27].mxu0  ;;  %v100_v3 = vld [vmem:[%s4919_s3 + $0x48] sm:$0xff] }
 0xd6e   :  { %v2868_v30 = vadd.f32 %v2867_v27, %v2866_v23  ;;  %v2860_v32 = vsel %vm156_vm0, %v2767_v29, 0.0  ;;  %v3719_v31 = vpop.f32.mrb[26].mxu1  ;;  %v98_v23 = vld [vmem:[%s4919_s3 + $0x38] sm:$0xff]  ;;  %v101_v27 = vld [vmem:[%s4919_s3 + $0x50] sm:$0xff] }
 0xd6f   :  { %v2861_v33 = vadd.f32 %v2860_v32, %v2859_v26  ;;  %v2869_v1 = vsel %vm156_vm0, %v3719_v31, 0.0  ;;  %v2848_v35 = vpop.f32.mrb[27].mxu1  ;;  %v3941_v24 = vpack.c.bf16 %v98_v23, %v97_v22  ;;  %v99_v26 = vld [vmem:[%s4919_s3 + $0x40] sm:$0xff] }
 0xd70   :  { %v2870_v49 = vadd.f32 %v2869_v1, %v2868_v30  ;;  %v2862_v25 = vsel %vm156_vm0, %v2848_v35, 0.0  ;;  %v3945_v29 = vpack.c.bf16 %v100_v3, %v99_v26  ;;  %v102_v30 = vld [vmem:[%s4919_s3 + $0x58] sm:$0xff]  ;;  %v103_v31 = vld [vmem:[%s4919_s3 + $0x60] sm:$0xff]  ;;  %v105_v1 = vld [vmem:[%s4919_s3 + $0x70] sm:$0xff] }
 0xd71   :  { %v2863_v28 = vadd.f32 %v2862_v25, %v2861_v33  ;;  %3942 = vmatprep.subr.bf16.mxu1 %v3941_v24  ;;  %v3949_v32 = vpack.c.bf16 %v102_v30, %v101_v27  ;;  %v104_v33 = vld [vmem:[%s4919_s3 + $0x68] sm:$0xff]  ;;  %v106_v35 = vld [vmem:[%s4919_s3 + $0x78] sm:$0xff] }
 0xd72   :  { %v2876_v36 = vadd.f32 %v3334_v34, %v2870_v49  ;;  %3944 = vmatpush3.bf16.msra.mxu1 %v3941_v24  ;;  %v3957_v49 = vpack.c.bf16 %v106_v35, %v105_v1  ;;  %v3337_v25 = vld [vmem:[%s4921_s5 + $0xb] ss:$0 sm:$0xff] }
 0xd73   :  { %v2875_v37 = vadd.f32 %v3334_v34, %v2863_v28  ;;  %3946 = vmatprep.subr.bf16.mxu1 %v3945_v29  ;;  %v3953_v34 = vpack.c.bf16 %v104_v33, %v103_v31  ;;  %v3342_v33 = vld [vmem:[%s4921_s5 + $0xe] ss:$0 sm:$0xff] }
 0xd74   :  { %v4785_v39 = vadd.f32 %v2876_v36, %v4544_v7 }
 0xd75   :  { %v4788_v43 = vadd.f32 %v2875_v37, %v4547_v8 }
 0xd76   :  { %v2882_v38 = vsel %vm156_vm0, %v4785_v39, 0.0  ;;  %3948 = vmatpush3.bf16.msra.mxu1 %v3945_v29  ;;  %v3341_v29 = vld [vmem:[%s4921_s5 + $0xd] ss:$0 sm:$0xff] }
 0xd77   :  { %2883 = vadd.xlane.f32.xlu1 %v2882_v38  ;;  %v2879_v40 = vsel %vm156_vm0, %v4788_v43, 0.0  ;;  %3950 = vmatprep.subr.bf16.mxu1 %v3949_v32 }
 0xd78   :  { %2880 = vadd.xlane.f32.xlu0 %v2879_v40 }
 0xd7a   :  { %3952 = vmatpush3.bf16.msra.mxu1 %v3949_v32 }
 0xd7b   :  { %3954 = vmatprep.subr.bf16.mxu1 %v3953_v34 }
 0xd7e   :  { %3956 = vmatpush3.bf16.msra.mxu1 %v3953_v34 }
 0xd7f   :  { %3958 = vmatprep.subr.bf16.mxu1 %v3957_v49 }
 0xd82   :  { %3960 = vmatpush3.bf16.msra.mxu1 %v3957_v49 }
 0xe04   :  { %v2884_v42 = vpop.xlane.xlu1 %2883 }
 0xe05   :  { %v2886_v46 = vmul.f32 0.03125, %v2884_v42  ;;  %v2881_v12 = vpop.xlane.xlu0 %2880 }
 0xe06   :  { %v2885_v21 = vmul.f32 0.03125, %v2881_v12 }
 0xe07   :  { %v2888_v47 = vsub.f32 %v4785_v39, %v2886_v46 }
 0xe08   :  { %v2887_v7 = vsub.f32 %v4788_v43, %v2885_v21 }
 0xe09   :  { %v2890_v51 = vmul.f32 %v2888_v47, %v2888_v47 }
 0xe0a   :  { %v2889_v50 = vmul.f32 %v2887_v7, %v2887_v7 }
 0xe0b   :  { %v2894_v53 = vsel %vm156_vm0, %v2890_v51, 0.0 }
 0xe0c   :  { %v2891_v8 = vsel %vm156_vm0, %v2889_v50, 0.0 }
 0xe0d   :  { %2892 = vadd.xlane.f32.xlu0 %v2891_v8 }
 0xe11   :  { %2895 = vadd.xlane.f32.xlu0 %v2894_v53 }
 0xe9a   :  { %v2893_v41 = vpop.xlane.xlu0 %2892 }
 0xe9b   :  { %v2897_v57 = vmul.f32 0.03125, %v2893_v41 }
 0xe9d   :  { %v2899_v55 = vadd.f32 1e-05, %v2897_v57 }
 0xe9e   :  { %v2896_v58 = vpop.xlane.xlu0 %2895 }
 0xe9f   :  { %4163 = vrsqrt.f32 %v2899_v55  ;;  %v2898_v59 = vmul.f32 0.03125, %v2896_v58  ;;  %v3340_v55 = vld [vmem:[%s4921_s5 + $0xc] ss:$0 sm:$0xff] }
 0xea1   :  { %v2900_v60 = vadd.f32 1e-05, %v2898_v59 }
 0xea3   :  { %4165 = vrsqrt.f32 %v2900_v60 }
 0xea9   :  { %v4164_v61 = vpop.eup %4163 }
 0xeaa   :  { %v2903_v11 = vmul.f32 %v4164_v61, %v2887_v7 }
 0xeac   :  { %v2909_v16 = vmul.f32 %v3335_v9, %v2903_v11 }
 0xead   :  { %v4166_v15 = vpop.eup %4165 }
 0xeae   :  { %v2904_v18 = vmul.f32 %v4166_v15, %v2888_v47  ;;  %v2915_v62 = vadd.f32 %v3336_v13, %v2909_v16 }
 0xeb0   :  { %v2910_v63 = vmul.f32 %v3335_v9, %v2904_v18  ;;  %3728 = vmatprep.mubr.msk.f32.mxu0 %vm156_vm0, %v2915_v62 }
 0xeb2   :  { %v2916_v2 = vadd.f32 %v3336_v13, %v2910_v63 }
 0xeb4   :  { %3729 = vmatmul.mubr.msk.f32.vlgmr.msra.gmra.mrb[28].mxu0 %vm156_vm0, %v2916_v2 }
 0xeb5   :  { %3964 = vmatpush3.bf16.msra.mxu0 %v3961_v10 }
 0xeb6   :  { %3966 = vmatprep.subr.bf16.mxu0 %v3965_v17 }
 0xeb9   :  { %3968 = vmatpush3.bf16.msra.mxu0 %v3965_v17 }
 0xf87   :  { %v3730_v28 = vpop.f32.mrb[28].mxu0 }
 0xf88   :  { %v2999_v36 = vadd.f32 %v3730_v28, %v3337_v25  ;;  %v2993_v37 = vpop.f32.mrb[29].mxu0 }
 0xf89   :  { %v2994_v38 = vadd.f32 %v3337_v25, %v2993_v37  ;;  %v3343_v25 = vld [vmem:[%s4921_s5 + $0xf] ss:$0 sm:$0xff] }
 0xf8a   :  { %v3003_v40 = vmul.f32 %v2999_v36, %v2999_v36 }
 0xf8b   :  { %v3002_v42 = vmul.f32 %v2994_v38, %v2994_v38 }
 0xf8c   :  { %v3005_v46 = vmul.f32 %v3003_v40, %v2999_v36 }
 0xf8d   :  { %v3004_v12 = vmul.f32 %v3002_v42, %v2994_v38 }
 0xf8e   :  { %v3007_v21 = vmul.f32 0.044715, %v3005_v46 }
 0xf8f   :  { %v3006_v47 = vmul.f32 0.044715, %v3004_v12 }
 0xf90   :  { %v3009_v7 = vadd.f32 %v3007_v21, %v2999_v36 }
 0xf91   :  { %v3008_v50 = vadd.f32 %v3006_v47, %v2994_v38 }
 0xf92   :  { %v3011_v8 = vmul.f32 0.7978846, %v3009_v7 }
 0xf93   :  { %v3010_v51 = vmul.f32 0.7978846, %v3008_v50 }
 0xf94   :  { %4167 = vtanh.f32 %v3011_v8 }
 0xf95   :  { %4169 = vtanh.f32 %v3010_v51 }
 0xf9e   :  { %v4168_v53 = vpop.eup %4167 }
 0xf9f   :  { %v4170_v54 = vpop.eup %4169  ;;  %v3015_v44 = vadd.f32 1.0, %v4168_v53 }
 0xfa0   :  { %v3014_v48 = vadd.f32 1.0, %v4170_v54 }
 0xfa1   :  { %v3017_v56 = vmul.f32 0.5, %v3015_v44 }
 0xfa2   :  { %v3016_v52 = vmul.f32 0.5, %v3014_v48 }
 0xfa3   :  { %v3019_v41 = vmul.f32 %v3017_v56, %v2999_v36 }
 0xfa4   :  { %v3018_v45 = vmul.f32 %v3016_v52, %v2994_v38 }
 0xfa6   :  { %3763 = vmatprep.mubr.f32.mxu1 %v3018_v45 }
 0xfa7   :  { %3764 = vmatmul.mubr.f32.vlgmr.msra.gmra.mrb[28].mxu1 %v3019_v41 }
0x107a   :  { %v3765_v57 = vpop.f32.mrb[28].mxu1 }
0x107b   :  { %v3096_v58 = vadd.f32 %v3765_v57, %v4785_v39  ;;  %v3086_v59 = vpop.f32.mrb[29].mxu1 }
0x107c   :  { %v3095_v60 = vadd.f32 %v3086_v59, %v4788_v43 }
0x107d   :  { %v3102_v61 = vadd.f32 %v3340_v55, %v3096_v58 }
0x107e   :  { %v3101_v9 = vadd.f32 %v3340_v55, %v3095_v60 }
0x107f   :  { %v3106_v11 = vsel %vm156_vm0, %v3102_v61, 0.0 }
0x1080   :  { %3107 = vadd.xlane.f32.xlu1 %v3106_v11  ;;  %v3103_v13 = vsel %vm156_vm0, %v3101_v9, 0.0 }
0x1081   :  { %3104 = vadd.xlane.f32.xlu0 %v3103_v13 }
0x110d   :  { %v3108_v16 = vpop.xlane.xlu1 %3107 }
0x110e   :  { %v3110_v15 = vmul.f32 0.03125, %v3108_v16  ;;  %v3105_v18 = vpop.xlane.xlu0 %3104 }
0x110f   :  { %v3109_v62 = vmul.f32 0.03125, %v3105_v18 }
0x1110   :  { %v3112_v63 = vsub.f32 %v3102_v61, %v3110_v15 }
0x1111   :  { %v3111_v2 = vsub.f32 %v3101_v9, %v3109_v62 }
0x1112   :  { %v3114_v20 = vmul.f32 %v3112_v63, %v3112_v63 }
0x1113   :  { %v3113_v4 = vmul.f32 %v3111_v2, %v3111_v2 }
0x1114   :  { %v3118_v39 = vsel %vm156_vm0, %v3114_v20, 0.0 }
0x1115   :  { %3119 = vadd.xlane.f32.xlu1 %v3118_v39  ;;  %v3115_v43 = vsel %vm156_vm0, %v3113_v4, 0.0 }
0x1116   :  { %3116 = vadd.xlane.f32.xlu0 %v3115_v43 }
0x11a2   :  { %v3120_v19 = vpop.xlane.xlu1 %3119 }
0x11a3   :  { %v3122_v22 = vmul.f32 0.03125, %v3120_v19  ;;  %v3117_v23 = vpop.xlane.xlu0 %3116 }
0x11a4   :  { %v3121_v24 = vmul.f32 0.03125, %v3117_v23 }
0x11a5   :  { %v3124_v26 = vadd.f32 1e-05, %v3122_v22 }
0x11a6   :  { %v3123_v3 = vadd.f32 1e-05, %v3121_v24 }
0x11a7   :  { %4171 = vrsqrt.f32 %v3124_v26 }
0x11a8   :  { %4173 = vrsqrt.f32 %v3123_v3 }
0x11b1   :  { %v4172_v27 = vpop.eup %4171 }
0x11b2   :  { %v4174_v30 = vpop.eup %4173  ;;  %v3128_v32 = vmul.f32 %v4172_v27, %v3112_v63 }
0x11b3   :  { %v3127_v31 = vmul.f32 %v4174_v30, %v3111_v2 }
0x11b4   :  { %v3134_v34 = vmul.f32 %v3341_v29, %v3128_v32 }
0x11b5   :  { %v3133_v1 = vmul.f32 %v3341_v29, %v3127_v31 }
0x11b6   :  { %v3140_v49 = vadd.f32 %v3342_v33, %v3134_v34 }
0x11b7   :  { %v3139_v35 = vadd.f32 %v3342_v33, %v3133_v1 }
0x11b9   :  { %3774 = vmatprep.mubr.msk.f32.mxu0 %vm156_vm0, %v3139_v35 }
0x11ba   :  { %3775 = vmatmul.mubr.msk.f32.vlgmr.msra.gmra.mrb[30].mxu0 %vm156_vm0, %v3140_v49 }
0x128d   :  { %v3776_v28 = vpop.f32.mrb[30].mxu0 }
0x128e   :  { %v3223_v36 = vadd.f32 %v3776_v28, %v3343_v25  ;;  %v3217_v37 = vpop.f32.mrb[31].mxu0 }
0x128f   :  { %v3218_v38 = vadd.f32 %v3343_v25, %v3217_v37 }
0x1290   :  { %3227 = vst [vmem:[#allocation8 + $0x8] sm:$0xff] %v3223_v36 }
0x1291   :  { %3226 = vst [vmem:[#allocation8] sm:$0xff] %v3218_v38 }
0x1292   :  { %4252 = shalt.err (!%p4249_p0)
}
0x1293   :  { %s4253_s5 = scalar_lea.hbm %s4922_s6, 256 }
0x1294   :  { %p4254_p1 = scmp.ne.s32.totalorder %s4922_s6, %s4253_s5  ;;  %p4257_p2 = scmp.lt.u32.totalorder %s4253_s5, %s4922_s6 }
0x1296   :  { %p4259_p3 = pnand %p4257_p2, %p4254_p1 }
0x1298   :  { %4262 = shalt.err (!%p4259_p3)
}
0x1299   :  { %3239 = dma.vmem_to_hbm [thread:$0]  %s3234_s18, 256, %s4922_s6, [#allocation4], %s4271_s9, %s4271_s9, %s4272_s10  }
0x129a   :  { %4267 = dma.done.wait [#allocation4], 256  }
0x129b   :  { %4268 = vsyncadd [#allocation4], 4294967040 }
0x129c   :  { %3243 = vsyncpa [#allocation3], 1 }
0x129d   :  { %3244 = vsyncpa [#allocation6], 1 }
0x129e   :  { %3245 = vsyncpa [#allocation4], 1 }

</bundles_post_ra>
